<compile_context>
chip_gen: v6e
topology: v6e:2x2x1
jax: 0.10.0
libtpu: 0.0.40
codegen_flags: <defaults>
</compile_context>

<pallas_src>
import numpy as np

import jax
import jax.numpy as jnp
from jax.experimental import pallas as pl
from jax.experimental.pallas import tpu as pltpu

# ---------------------------------------------------------------------------
# Synthetic NVAE-decoder configuration (small, deterministic).
# ---------------------------------------------------------------------------
B = 2          # batch
CZ = 4         # latent channels  -> z0_size = (CZ, H0, W0)
CS = 8         # decoder feature channels (prior_ftr0 channels)
H0 = 4         # initial spatial size
W0 = 4
Z_DIM = CZ * H0 * W0   # = 64, flat latent dimension fed to forward()
TEMP = 1.0             # config.z_truncation (only used for sampled groups)

# Lane extents of the batch-packed channels-first activations per resolution.
_L0 = B * H0 * W0            # 4x4   ->  32 lanes
_L1 = 4 * _L0                # 8x8   -> 128 lanes
_L2 = 4 * _L1                # 16x16 -> 512 lanes
_R2 = 16 * H0 * W0           # pixels per image at the output resolution = 256

# ---------------------------------------------------------------------------
# Packed-weight slab layout (one 128-lane-wide f32 array, 8-row stripes).
# ---------------------------------------------------------------------------
SLAB_COLS = 128
R_PRIOR = 0      # (CS, B*16)  prior_ftr0, channels-first, tiled over batch
R_COMB0 = 8      # [ Ws (8,8) | Wz (8,4) | b (8,1) ]
R_CELL1 = 16     # [ W2d (8,72) | b (8,1) ]
R_UP    = 24     # [ W2d (8,72) | b (8,1) ]
R_SAMP  = 32     # [ W  (8,8)  | b (8,1) ]
R_COMB1 = 40     # [ Ws (8,8) | Wz (8,4) | b (8,1) ]
R_CELL4 = 48     # [ W2d (8,72) | b (8,1) ]
R_POST  = 56     # [ W2d (8,72) | b (8,1) ]
R_IMG   = 64     # [ W2d (3,72) | b (3,1) ]   (rows 3..7 unused)
R_G1    = 72     # (32, 128) 4x4 -> 8x8 nearest-up one-hot (batch block-diag)
SLAB_ROWS = R_G1 + _L0       # = 104  (multiple of 8)


# ---------------------------------------------------------------------------
# In-kernel helpers.
# ---------------------------------------------------------------------------
def _swish(x):
    return x * jax.nn.sigmoid(x)


def _elu(x):
    # exp is guarded so the not-taken branch cannot produce inf.
    return jnp.where(x > 0.0, x, jnp.exp(jnp.minimum(x, 0.0)) - 1.0)


def _edge_masks(Wd, L):
    """Tap-validity masks for a batch-packed channels-first (CS, L) map.

    lane = b*H*W + i*W + j with square images (H == Wd); H*W and Wd are powers
    of two so no integer division is needed.  Built once per resolution and
    reused by both convs at that resolution (hoisted per the perf review).
    """
    hw = Wd * Wd
    lane = jax.lax.broadcasted_iota(jnp.int32, (CS, L), 1)
    r = lane & (hw - 1)          # per-image pixel index
    j = r & (Wd - 1)             # column
    m_top = r >= Wd              # i > 0     (row i-1 is inside the image)
    m_bot = r < hw - Wd          # i < H-1   (row i+1 is inside the image)
    m_left = j > 0               # column j-1 inside
    m_right = j < Wd - 1         # column j+1 inside
    return m_top, m_bot, m_left, m_right


def _conv3x3(xact, w2d, bias, Wd, L, masks):
    """'same' 3x3 conv of a channels-first (CS, L) batch-packed map.

    The 9 taps are lane-axis rolls of the register-resident activation with
    out-of-image (and cross-image) reads masked to zero; the taps are stacked
    on the sublane axis into an im2col matrix so the whole conv is a single
    MXU dot (Cout, 9*CS) @ (9*CS, L), bf16 operands / f32 accumulation.
    No VMEM halo scratch, no per-tap weight pushes.
    """
    m_top, m_bot, m_left, m_right = masks
    taps = []
    for dy in (-1, 0, 1):
        for dx in (-1, 0, 1):
            off = dy * Wd + dx
            t = xact if off == 0 else jnp.roll(xact, -off, axis=1)
            m = None
            if dy == -1:
                m = m_top
            elif dy == 1:
                m = m_bot
            if dx == -1:
                m = m_left if m is None else jnp.logical_and(m, m_left)
            elif dx == 1:
                m = m_right if m is None else jnp.logical_and(m, m_right)
            if m is not None:
                t = jnp.where(m, t, 0.0)
            taps.append(t)
    xcat = jnp.concatenate(taps, axis=0)                       # (9*CS, L)
    y = jnp.dot(w2d.astype(jnp.bfloat16), xcat.astype(jnp.bfloat16),
                preferred_element_type=jnp.float32)
    return y + bias


# ---------------------------------------------------------------------------
# The fused decoder kernel (one program = the whole batch).
# ---------------------------------------------------------------------------
def _decoder_kernel(z_ref, slab_ref, g2_ref, out_ref):
    f32 = jnp.float32

    def stripe(r0):                       # one 8-row slab stripe (8, 128)
        return slab_ref[r0:r0 + 8, :]

    def conv_wb(r0, cout=CS):
        s8 = stripe(r0)
        return s8[:cout, 0:9 * CS], s8[:cout, 9 * CS:9 * CS + 1]

    def comb_wb(r0):
        s8 = stripe(r0)
        return s8[:, 0:CS], s8[:, CS:CS + CZ], s8[:, CS + CZ:CS + CZ + 1]

    # Hoisted edge masks, shared by the two convs at each resolution.
    masks4 = _edge_masks(W0, _L0)
    masks8 = _edge_masks(2 * W0, _L1)
    masks16 = _edge_masks(4 * W0, _L2)

    z0 = z_ref[...]                                   # (CZ, B*16)
    s = stripe(R_PRIOR)[:, 0:_L0]                     # (CS, B*16) prior_ftr0

    # ---- dec_tower ---------------------------------------------------------
    # combiner_dec #0: Conv1x1(cat(s, z0)) == Ws @ s + Wz @ z0 + b
    ws, wz, cb = comb_wb(R_COMB0)
    s = (jnp.dot(ws, s, preferred_element_type=f32)
         + jnp.dot(wz, z0, preferred_element_type=f32) + cb)

    # normal residual cell @ 4x4: s = s + conv3x3(swish(s))
    w, b = conv_wb(R_CELL1)
    s = s + _conv3x3(_swish(s), w, b, W0, _L0, masks4)

    # up_dec cell (scale_ind += 1): u = nearest_up2(s); s = u + conv3x3(swish(u))
    g1 = slab_ref[R_G1:R_G1 + _L0, :]                 # (32, 128) 0/1 gather
    u = jnp.dot(s, g1, preferred_element_type=f32)    # 4x4 -> 8x8
    w, b = conv_wb(R_UP)
    s = u + _conv3x3(_swish(u), w, b, 2 * W0, _L1, masks8)

    # dec_sampler[0]: ELU -> Conv1x1 -> (mu, log_sigma); idx_dec <= 7 -> z = mu.
    sp = stripe(R_SAMP)
    p = (jnp.dot(sp[:, 0:CS], _elu(s), preferred_element_type=f32)
         + sp[:, CS:CS + 1])
    mu = p[0:CZ, :]
    # TODO(synk): groups with idx_dec > 7 draw z = mu + TEMP*exp(log_sigma)*eps;
    # this 2-group synthetic tower never reaches that branch.

    # combiner_dec #1
    ws, wz, cb = comb_wb(R_COMB1)
    s = (jnp.dot(ws, s, preferred_element_type=f32)
         + jnp.dot(wz, mu, preferred_element_type=f32) + cb)

    # normal residual cell @ 8x8
    w, b = conv_wb(R_CELL4)
    s = s + _conv3x3(_swish(s), w, b, 2 * W0, _L1, masks8)

    # ---- post_process up cell: 8x8 -> 16x16 --------------------------------
    u = jnp.dot(s, g2_ref[...], preferred_element_type=f32)
    w, b = conv_wb(R_POST)
    s = u + _conv3x3(_swish(u), w, b, 4 * W0, _L2, masks16)

    # ---- image_conditional (ELU -> Conv3x3) + Bernoulli-mean output --------
    # TODO(synk): real checkpoints use a DiscMixLogistic head; its mixture mean
    # is replaced by the Bernoulli-mean branch (sigmoid), then *2 - 1.
    w, b = conv_wb(R_IMG, cout=3)
    logits = _conv3x3(_elu(s), w, b, 4 * W0, _L2, masks16)    # (3, B*256)
    img = jax.nn.sigmoid(logits) * 2.0 - 1.0

    # Lane-dense writeback: one plain (3, 256) store per image (256 = 2x128).
    for bb in range(B):
        out_ref[bb] = img[:, bb * _R2:(bb + 1) * _R2]


# ---------------------------------------------------------------------------
# Host-side glue.
# ---------------------------------------------------------------------------
def _nn_upsample_matrix(H, W):
    """0/1 matrix G (B*H*W, B*2H*2W): x_cf @ G is the nearest x2 upsample of a
    batch-packed channels-first map (lane = b*H*W + i*W + j)."""
    hout, wout = 2 * H, 2 * W
    dst = np.arange(B * hout * wout)
    bb = dst // (hout * wout)
    rd = dst % (hout * wout)
    i2, j2 = rd // wout, rd % wout
    src = bb * (H * W) + (i2 // 2) * W + (j2 // 2)
    g = np.zeros((B * H * W, B * hout * wout), np.float32)
    g[src, dst] = 1.0
    return g


def pack_decoder_operands(params):
    """One-time host-side packing of every weight / bias / upsample operand
    into a single lane-padded slab (+ the 8x8->16x16 gather matrix)."""
    p = {k: np.asarray(v, np.float32) for k, v in params.items()}
    slab = np.zeros((SLAB_ROWS, SLAB_COLS), np.float32)

    def put(r, c, a):
        slab[r:r + a.shape[0], c:c + a.shape[1]] = a

    # prior_ftr0: HWC -> channels-first (CS, 16), tiled over the packed batch.
    prior_cf = p["prior_ftr0"].transpose(2, 0, 1).reshape(CS, H0 * W0)
    put(R_PRIOR, 0, np.tile(prior_cf, (1, B)))

    def put_comb(r, w, bias):            # cat(s, z) 1x1: out = Ws@s + Wz@z + b
        put(r, 0, w[:CS].T)              # (CS, CS)
        put(r, CS, w[CS:].T)             # (CS, CZ)
        put(r, CS + CZ, bias.reshape(-1, 1))

    def put_conv(r, w, bias):            # (3,3,Cin,Cout) -> (Cout, 9*Cin)
        cout = w.shape[-1]
        put(r, 0, w.transpose(3, 0, 1, 2).reshape(cout, 9 * CS))
        put(r, 9 * CS, bias.reshape(-1, 1))

    put_comb(R_COMB0, p["comb0_w"], p["comb0_b"])
    put_conv(R_CELL1, p["cell1_w"], p["cell1_b"])
    put_conv(R_UP, p["up_w"], p["up_b"])
    put(R_SAMP, 0, p["samp0_w"].T)                    # (2*CZ, CS)
    put(R_SAMP, CS, p["samp0_b"].reshape(-1, 1))
    put_comb(R_COMB1, p["comb1_w"], p["comb1_b"])
    put_conv(R_CELL4, p["cell4_w"], p["cell4_b"])
    put_conv(R_POST, p["post_w"], p["post_b"])
    put_conv(R_IMG, p["img_w"], p["img_b"])
    put(R_G1, 0, _nn_upsample_matrix(H0, W0))         # (32, 128)

    g2 = _nn_upsample_matrix(2 * H0, 2 * W0)          # (128, 512)
    return jnp.asarray(slab), jnp.asarray(g2)


def nvae_dec_forward(slab, g2, z):
    """Fused decoder forward.  z: (B, Z_DIM) flat latents."""
    bsz = z.shape[0]
    assert bsz == B, "kernel is specialized to the packed batch size"

    # z.reshape(B, CZ, H0, W0) (NCHW) -> channels-first, batch packed on lanes.
    z_cf = (z.astype(jnp.float32)
            .reshape(bsz, CZ, H0 * W0)
            .transpose(1, 0, 2)
            .reshape(CZ, bsz * H0 * W0))

    out = pl.pallas_call(
        _decoder_kernel,
        out_shape=jax.ShapeDtypeStruct((bsz, 3, _R2), jnp.float32),
        grid=(1,),   # single step: both images are packed along lanes
        in_specs=[
            pl.BlockSpec((CZ, bsz * H0 * W0), lambda i: (0, 0)),
            pl.BlockSpec((SLAB_ROWS, SLAB_COLS), lambda i: (0, 0)),
            pl.BlockSpec((_L1, _L2), lambda i: (0, 0)),
        ],
        out_specs=pl.BlockSpec((bsz, 3, _R2), lambda i: (0, 0, 0)),
        compiler_params=pltpu.CompilerParams(
            dimension_semantics=("arbitrary",)),
        # TODO(synk): on v7x, trace-compare against grid=(2,) with
        # dimension_semantics=("parallel",) (one image per TensorCore).
    )(z_cf, slab, g2)

    # (B, 3, 256) is already channel-major: reshape (zero-copy) to NCHW.
    return out.reshape(bsz, 3, 4 * H0, 4 * W0)


# ---------------------------------------------------------------------------
# Parameters (deterministic synthetic init; shapes follow the NVAE decoder).
# ---------------------------------------------------------------------------
def init_params(key):
    ks = jax.random.split(key, 10)

    def w(k, shape, fan_in):
        return jax.random.normal(k, shape, jnp.float32) / jnp.sqrt(fan_in)

    return {
        # prior_ftr0 (NVAE learnable constant), stored HWC
        "prior_ftr0": 0.1 * jax.random.normal(ks[0], (H0, W0, CS), jnp.float32),
        # combiner_dec #0: Conv1x1(CS + CZ -> CS) on cat(s, z)
        "comb0_w": w(ks[1], (CS + CZ, CS), CS + CZ),
        "comb0_b": jnp.zeros((CS,), jnp.float32),
        # normal dec cell: s + conv3x3(swish(s))
        "cell1_w": w(ks[2], (3, 3, CS, CS), 9 * CS),
        "cell1_b": jnp.zeros((CS,), jnp.float32),
        # up_dec cell: u = up(s); u + conv3x3(swish(u))
        "up_w": w(ks[3], (3, 3, CS, CS), 9 * CS),
        "up_b": jnp.zeros((CS,), jnp.float32),
        # dec_sampler[0]: ELU -> Conv1x1(CS -> 2*CZ) giving (mu, log_sigma)
        "samp0_w": w(ks[4], (CS, 2 * CZ), CS),
        "samp0_b": jnp.zeros((2 * CZ,), jnp.float32),
        # combiner_dec #1
        "comb1_w": w(ks[5], (CS + CZ, CS), CS + CZ),
        "comb1_b": jnp.zeros((CS,), jnp.float32),
        # normal dec cell
        "cell4_w": w(ks[6], (3, 3, CS, CS), 9 * CS),
        "cell4_b": jnp.zeros((CS,), jnp.float32),
        # post_process up cell
        "post_w": w(ks[7], (3, 3, CS, CS), 9 * CS),
        "post_b": jnp.zeros((CS,), jnp.float32),
        # image_conditional: ELU -> Conv3x3(CS -> 3)
        "img_w": w(ks[8], (3, 3, CS, 3), 9 * CS),
        "img_b": jnp.zeros((3,), jnp.float32),
    }


# ---------------------------------------------------------------------------
# Independent float64 NumPy reference (mirrors the torch module's math).
# ---------------------------------------------------------------------------
def _numpy_reference(params, z):
    p = {k: np.asarray(v, np.float64) for k, v in params.items()}
    z = np.asarray(z, np.float64)

    def swish(x):
        return x / (1.0 + np.exp(-x))

    def elu(x):
        return np.where(x > 0.0, x, np.exp(np.minimum(x, 0.0)) - 1.0)

    def conv1x1(x, w, b):
        return x @ w + b

    def conv3x3(x, w, b):
        bn, h, wdt, cin = x.shape
        cout = w.shape[-1]
        xp = np.zeros((bn, h + 2, wdt + 2, cin))
        xp[:, 1:-1, 1:-1, :] = x
        out = np.zeros((bn, h, wdt, cout)) + b
        for ky in range(3):
            for kx in range(3):
                out += np.einsum("bhwc,co->bhwo",
                                 xp[:, ky:ky + h, kx:kx + wdt, :], w[ky, kx])
        return out

    def up2(x):
        return x.repeat(2, axis=1).repeat(2, axis=2)

    bsz = z.shape[0]
    z0 = z.reshape(bsz, CZ, H0, W0).transpose(0, 2, 3, 1)
    s = np.broadcast_to(p["prior_ftr0"], (bsz, H0, W0, CS))
    s = conv1x1(np.concatenate([s, z0], -1), p["comb0_w"], p["comb0_b"])
    s = s + conv3x3(swish(s), p["cell1_w"], p["cell1_b"])
    u = up2(s)
    s = u + conv3x3(swish(u), p["up_w"], p["up_b"])
    q = conv1x1(elu(s), p["samp0_w"], p["samp0_b"])
    mu = q[..., :CZ]
    s = conv1x1(np.concatenate([s, mu], -1), p["comb1_w"], p["comb1_b"])
    s = s + conv3x3(swish(s), p["cell4_w"], p["cell4_b"])
    u = up2(s)
    s = u + conv3x3(swish(u), p["post_w"], p["post_b"])
    logits = conv3x3(elu(s), p["img_w"], p["img_b"])
    img = 1.0 / (1.0 + np.exp(-logits)) * 2.0 - 1.0
    return img.transpose(0, 3, 1, 2)


# ---------------------------------------------------------------------------
if __name__ == "__main__":
    key = jax.random.PRNGKey(0)
    k_param, k_z = jax.random.split(key)
    params = init_params(k_param)
    z = jax.random.normal(k_z, (B, Z_DIM), jnp.float32)

    slab, g2 = pack_decoder_operands(params)     # one-time weight packing
    fwd = jax.jit(nvae_dec_forward)
    out = jax.block_until_ready(fwd(slab, g2, z))

    assert out.shape == (B, 3, 4 * H0, 4 * W0), out.shape
    assert out.dtype == jnp.float32
    assert bool(jnp.all(jnp.isfinite(out)))
    assert bool(jnp.all(out >= -1.0)) and bool(jnp.all(out <= 1.0))

    ref = _numpy_reference(params, z)
    err = float(np.max(np.abs(np.asarray(out, dtype=np.float64) - ref)))
    # Conv dots run with bf16 operands (the torch module uses autocast);
    # everything else is f32, so the error stays far below this bound.
    assert err < 3e-2, f"max abs error vs float64 reference: {err}"

    print("KERNEL_OK")
</pallas_src>

<mosaic_0001>
module attributes {stable_mosaic.version = 11 : i64} {
  func.func @_decoder_kernel(%arg0: i32, %arg1: memref<4x32xf32, #tpu.memory_space<vmem>>, %arg2: memref<104x128xf32, #tpu.memory_space<vmem>>, %arg3: memref<128x512xf32, #tpu.memory_space<vmem>>, %arg4: memref<2x3x256xf32, #tpu.memory_space<vmem>>) attributes {dimension_semantics = [#tpu.dimension_semantics<arbitrary>], iteration_bounds = array<i64: 1>, scalar_prefetch = 0 : i64, scratch_operands = 0 : i64, tpu.core_type = #tpu.core_type<tc>, window_params = [{pipeline_mode = #tpu.pipeline_mode<synchronous>, transform_indices = @transform_0, window_bounds = array<i64: 4, 32>}, {pipeline_mode = #tpu.pipeline_mode<synchronous>, transform_indices = @transform_1, window_bounds = array<i64: 104, 128>}, {pipeline_mode = #tpu.pipeline_mode<synchronous>, transform_indices = @transform_2, window_bounds = array<i64: 128, 512>}, {pipeline_mode = #tpu.pipeline_mode<synchronous>, transform_indices = @transform_3, window_bounds = array<i64: 2, 3, 256>}]} {
    %0 = tpu.iota {dimensions = array<i32: 1>} : vector<8x32xi32>
    %c15_i32 = arith.constant 15 : i32
    %1 = vector.broadcast %c15_i32 : i32 to vector<8x32xi32>
    %2 = arith.andi %0, %1 : vector<8x32xi32>
    %c3_i32 = arith.constant 3 : i32
    %3 = vector.broadcast %c3_i32 : i32 to vector<8x32xi32>
    %4 = arith.andi %2, %3 : vector<8x32xi32>
    %c4_i32 = arith.constant 4 : i32
    %5 = vector.broadcast %c4_i32 : i32 to vector<8x32xi32>
    %6 = arith.cmpi sge, %2, %5 : vector<8x32xi32>
    %c12_i32 = arith.constant 12 : i32
    %7 = vector.broadcast %c12_i32 : i32 to vector<8x32xi32>
    %8 = arith.cmpi slt, %2, %7 : vector<8x32xi32>
    %c0_i32 = arith.constant 0 : i32
    %9 = vector.broadcast %c0_i32 : i32 to vector<8x32xi32>
    %10 = arith.cmpi sgt, %4, %9 : vector<8x32xi32>
    %c3_i32_0 = arith.constant 3 : i32
    %11 = vector.broadcast %c3_i32_0 : i32 to vector<8x32xi32>
    %12 = arith.cmpi slt, %4, %11 : vector<8x32xi32>
    %13 = tpu.iota {dimensions = array<i32: 1>} : vector<8x128xi32>
    %c63_i32 = arith.constant 63 : i32
    %14 = vector.broadcast %c63_i32 : i32 to vector<8x128xi32>
    %15 = arith.andi %13, %14 : vector<8x128xi32>
    %c7_i32 = arith.constant 7 : i32
    %16 = vector.broadcast %c7_i32 : i32 to vector<8x128xi32>
    %17 = arith.andi %15, %16 : vector<8x128xi32>
    %c8_i32 = arith.constant 8 : i32
    %18 = vector.broadcast %c8_i32 : i32 to vector<8x128xi32>
    %19 = arith.cmpi sge, %15, %18 : vector<8x128xi32>
    %c56_i32 = arith.constant 56 : i32
    %20 = vector.broadcast %c56_i32 : i32 to vector<8x128xi32>
    %21 = arith.cmpi slt, %15, %20 : vector<8x128xi32>
    %c0_i32_1 = arith.constant 0 : i32
    %22 = vector.broadcast %c0_i32_1 : i32 to vector<8x128xi32>
    %23 = arith.cmpi sgt, %17, %22 : vector<8x128xi32>
    %c7_i32_2 = arith.constant 7 : i32
    %24 = vector.broadcast %c7_i32_2 : i32 to vector<8x128xi32>
    %25 = arith.cmpi slt, %17, %24 : vector<8x128xi32>
    %26 = tpu.iota {dimensions = array<i32: 1>} : vector<8x512xi32>
    %c255_i32 = arith.constant 255 : i32
    %27 = vector.broadcast %c255_i32 : i32 to vector<8x512xi32>
    %28 = arith.andi %26, %27 : vector<8x512xi32>
    %c15_i32_3 = arith.constant 15 : i32
    %29 = vector.broadcast %c15_i32_3 : i32 to vector<8x512xi32>
    %30 = arith.andi %28, %29 : vector<8x512xi32>
    %c16_i32 = arith.constant 16 : i32
    %31 = vector.broadcast %c16_i32 : i32 to vector<8x512xi32>
    %32 = arith.cmpi sge, %28, %31 : vector<8x512xi32>
    %c240_i32 = arith.constant 240 : i32
    %33 = vector.broadcast %c240_i32 : i32 to vector<8x512xi32>
    %34 = arith.cmpi slt, %28, %33 : vector<8x512xi32>
    %c0_i32_4 = arith.constant 0 : i32
    %35 = vector.broadcast %c0_i32_4 : i32 to vector<8x512xi32>
    %36 = arith.cmpi sgt, %30, %35 : vector<8x512xi32>
    %c15_i32_5 = arith.constant 15 : i32
    %37 = vector.broadcast %c15_i32_5 : i32 to vector<8x512xi32>
    %38 = arith.cmpi slt, %30, %37 : vector<8x512xi32>
    %c0 = arith.constant 0 : index
    %c0_6 = arith.constant 0 : index
    %39 = vector.load %arg1[%c0, %c0_6] : memref<4x32xf32, #tpu.memory_space<vmem>>, vector<4x32xf32>
    %c0_7 = arith.constant 0 : index
    %c0_8 = arith.constant 0 : index
    %40 = vector.load %arg2[%c0_7, %c0_8] : memref<104x128xf32, #tpu.memory_space<vmem>>, vector<8x128xf32>
    %41 = vector.extract_strided_slice %40 {offsets = [0, 0], sizes = [8, 32], strides = [1, 1]} : vector<8x128xf32> to vector<8x32xf32>
    %c8 = arith.constant 8 : index
    %c0_9 = arith.constant 0 : index
    %42 = vector.load %arg2[%c8, %c0_9] : memref<104x128xf32, #tpu.memory_space<vmem>>, vector<8x128xf32>
    %43 = vector.extract_strided_slice %42 {offsets = [0, 0], sizes = [8, 8], strides = [1, 1]} : vector<8x128xf32> to vector<8x8xf32>
    %44 = vector.extract_strided_slice %42 {offsets = [0, 8], sizes = [8, 4], strides = [1, 1]} : vector<8x128xf32> to vector<8x4xf32>
    %45 = vector.extract_strided_slice %42 {offsets = [0, 12], sizes = [8, 1], strides = [1, 1]} : vector<8x128xf32> to vector<8x1xf32>
    %cst = arith.constant dense<0.000000e+00> : vector<8x32xf32>
    %46 = tpu.matmul %43, %41, %cst {dimension_numbers = #tpu.dot_dimension_numbers<[1], [0], [0], [1], [0, 0, 1, 1], [], []>} : vector<8x8xf32>, vector<8x32xf32>, vector<8x32xf32> -> vector<8x32xf32>
    %cst_10 = arith.constant dense<0.000000e+00> : vector<8x32xf32>
    %47 = tpu.matmul %44, %39, %cst_10 {dimension_numbers = #tpu.dot_dimension_numbers<[1], [0], [0], [1], [0, 0, 1, 1], [], []>} : vector<8x4xf32>, vector<4x32xf32>, vector<8x32xf32> -> vector<8x32xf32>
    %48 = arith.addf %46, %47 : vector<8x32xf32>
    %49 = vector.broadcast %45 : vector<8x1xf32> to vector<8x32xf32>
    %50 = arith.addf %48, %49 : vector<8x32xf32>
    %c16 = arith.constant 16 : index
    %c0_11 = arith.constant 0 : index
    %51 = vector.load %arg2[%c16, %c0_11] : memref<104x128xf32, #tpu.memory_space<vmem>>, vector<8x128xf32>
    %52 = vector.extract_strided_slice %51 {offsets = [0, 0], sizes = [8, 72], strides = [1, 1]} : vector<8x128xf32> to vector<8x72xf32>
    %53 = vector.extract_strided_slice %51 {offsets = [0, 72], sizes = [8, 1], strides = [1, 1]} : vector<8x128xf32> to vector<8x1xf32>
    %54 = arith.negf %50 : vector<8x32xf32>
    %55 = math.exp %54 : vector<8x32xf32>
    %cst_12 = arith.constant 1.000000e+00 : f32
    %56 = vector.broadcast %cst_12 : f32 to vector<8x32xf32>
    %57 = arith.addf %56, %55 : vector<8x32xf32>
    %58 = arith.divf %56, %57 : vector<8x32xf32>
    %59 = arith.mulf %50, %58 : vector<8x32xf32>
    %60 = vector.extract_strided_slice %59 {offsets = [0, 27], sizes = [8, 5], strides = [1, 1]} : vector<8x32xf32> to vector<8x5xf32>
    %61 = vector.extract_strided_slice %59 {offsets = [0, 0], sizes = [8, 27], strides = [1, 1]} : vector<8x32xf32> to vector<8x27xf32>
    %62 = tpu.concatenate %60, %61 in 1 : vector<8x5xf32>, vector<8x27xf32> -> vector<8x32xf32>
    %63 = arith.andi %6, %10 : vector<8x32xi1>
    %cst_13 = arith.constant 0.000000e+00 : f32
    %64 = vector.broadcast %cst_13 : f32 to vector<8x32xf32>
    %65 = arith.select %63, %62, %64 : vector<8x32xi1>, vector<8x32xf32>
    %66 = vector.extract_strided_slice %59 {offsets = [0, 28], sizes = [8, 4], strides = [1, 1]} : vector<8x32xf32> to vector<8x4xf32>
    %67 = vector.extract_strided_slice %59 {offsets = [0, 0], sizes = [8, 28], strides = [1, 1]} : vector<8x32xf32> to vector<8x28xf32>
    %68 = tpu.concatenate %66, %67 in 1 : vector<8x4xf32>, vector<8x28xf32> -> vector<8x32xf32>
    %cst_14 = arith.constant 0.000000e+00 : f32
    %69 = vector.broadcast %cst_14 : f32 to vector<8x32xf32>
    %70 = arith.select %6, %68, %69 : vector<8x32xi1>, vector<8x32xf32>
    %71 = vector.extract_strided_slice %59 {offsets = [0, 29], sizes = [8, 3], strides = [1, 1]} : vector<8x32xf32> to vector<8x3xf32>
    %72 = vector.extract_strided_slice %59 {offsets = [0, 0], sizes = [8, 29], strides = [1, 1]} : vector<8x32xf32> to vector<8x29xf32>
    %73 = tpu.concatenate %71, %72 in 1 : vector<8x3xf32>, vector<8x29xf32> -> vector<8x32xf32>
    %74 = arith.andi %6, %12 : vector<8x32xi1>
    %cst_15 = arith.constant 0.000000e+00 : f32
    %75 = vector.broadcast %cst_15 : f32 to vector<8x32xf32>
    %76 = arith.select %74, %73, %75 : vector<8x32xi1>, vector<8x32xf32>
    %77 = vector.extract_strided_slice %59 {offsets = [0, 31], sizes = [8, 1], strides = [1, 1]} : vector<8x32xf32> to vector<8x1xf32>
    %78 = vector.extract_strided_slice %59 {offsets = [0, 0], sizes = [8, 31], strides = [1, 1]} : vector<8x32xf32> to vector<8x31xf32>
    %79 = tpu.concatenate %77, %78 in 1 : vector<8x1xf32>, vector<8x31xf32> -> vector<8x32xf32>
    %cst_16 = arith.constant 0.000000e+00 : f32
    %80 = vector.broadcast %cst_16 : f32 to vector<8x32xf32>
    %81 = arith.select %10, %79, %80 : vector<8x32xi1>, vector<8x32xf32>
    %82 = vector.extract_strided_slice %59 {offsets = [0, 1], sizes = [8, 31], strides = [1, 1]} : vector<8x32xf32> to vector<8x31xf32>
    %83 = vector.extract_strided_slice %59 {offsets = [0, 0], sizes = [8, 1], strides = [1, 1]} : vector<8x32xf32> to vector<8x1xf32>
    %84 = tpu.concatenate %82, %83 in 1 : vector<8x31xf32>, vector<8x1xf32> -> vector<8x32xf32>
    %cst_17 = arith.constant 0.000000e+00 : f32
    %85 = vector.broadcast %cst_17 : f32 to vector<8x32xf32>
    %86 = arith.select %12, %84, %85 : vector<8x32xi1>, vector<8x32xf32>
    %87 = vector.extract_strided_slice %59 {offsets = [0, 3], sizes = [8, 29], strides = [1, 1]} : vector<8x32xf32> to vector<8x29xf32>
    %88 = vector.extract_strided_slice %59 {offsets = [0, 0], sizes = [8, 3], strides = [1, 1]} : vector<8x32xf32> to vector<8x3xf32>
    %89 = tpu.concatenate %87, %88 in 1 : vector<8x29xf32>, vector<8x3xf32> -> vector<8x32xf32>
    %90 = arith.andi %8, %10 : vector<8x32xi1>
    %cst_18 = arith.constant 0.000000e+00 : f32
    %91 = vector.broadcast %cst_18 : f32 to vector<8x32xf32>
    %92 = arith.select %90, %89, %91 : vector<8x32xi1>, vector<8x32xf32>
    %93 = vector.extract_strided_slice %59 {offsets = [0, 4], sizes = [8, 28], strides = [1, 1]} : vector<8x32xf32> to vector<8x28xf32>
    %94 = vector.extract_strided_slice %59 {offsets = [0, 0], sizes = [8, 4], strides = [1, 1]} : vector<8x32xf32> to vector<8x4xf32>
    %95 = tpu.concatenate %93, %94 in 1 : vector<8x28xf32>, vector<8x4xf32> -> vector<8x32xf32>
    %cst_19 = arith.constant 0.000000e+00 : f32
    %96 = vector.broadcast %cst_19 : f32 to vector<8x32xf32>
    %97 = arith.select %8, %95, %96 : vector<8x32xi1>, vector<8x32xf32>
    %98 = vector.extract_strided_slice %59 {offsets = [0, 5], sizes = [8, 27], strides = [1, 1]} : vector<8x32xf32> to vector<8x27xf32>
    %99 = vector.extract_strided_slice %59 {offsets = [0, 0], sizes = [8, 5], strides = [1, 1]} : vector<8x32xf32> to vector<8x5xf32>
    %100 = tpu.concatenate %98, %99 in 1 : vector<8x27xf32>, vector<8x5xf32> -> vector<8x32xf32>
    %101 = arith.andi %8, %12 : vector<8x32xi1>
    %cst_20 = arith.constant 0.000000e+00 : f32
    %102 = vector.broadcast %cst_20 : f32 to vector<8x32xf32>
    %103 = arith.select %101, %100, %102 : vector<8x32xi1>, vector<8x32xf32>
    %104 = tpu.concatenate %65, %70, %76, %81, %59, %86, %92, %97, %103 in 0 : vector<8x32xf32>, vector<8x32xf32>, vector<8x32xf32>, vector<8x32xf32>, vector<8x32xf32>, vector<8x32xf32>, vector<8x32xf32>, vector<8x32xf32>, vector<8x32xf32> -> vector<72x32xf32>
    %105 = arith.truncf %52 : vector<8x72xf32> to vector<8x72xbf16>
    %106 = arith.truncf %104 : vector<72x32xf32> to vector<72x32xbf16>
    %cst_21 = arith.constant dense<0.000000e+00> : vector<8x32xf32>
    %107 = tpu.matmul %105, %106, %cst_21 {dimension_numbers = #tpu.dot_dimension_numbers<[1], [0], [0], [1], [0, 0, 1, 1], [], []>} : vector<8x72xbf16>, vector<72x32xbf16>, vector<8x32xf32> -> vector<8x32xf32>
    %108 = vector.broadcast %53 : vector<8x1xf32> to vector<8x32xf32>
    %109 = arith.addf %107, %108 : vector<8x32xf32>
    %110 = arith.addf %50, %109 : vector<8x32xf32>
    %c72 = arith.constant 72 : index
    %c0_22 = arith.constant 0 : index
    %111 = vector.load %arg2[%c72, %c0_22] : memref<104x128xf32, #tpu.memory_space<vmem>>, vector<32x128xf32>
    %cst_23 = arith.constant dense<0.000000e+00> : vector<8x128xf32>
    %112 = tpu.matmul %110, %111, %cst_23 {dimension_numbers = #tpu.dot_dimension_numbers<[1], [0], [0], [1], [0, 0, 1, 1], [], []>} : vector<8x32xf32>, vector<32x128xf32>, vector<8x128xf32> -> vector<8x128xf32>
    %c24 = arith.constant 24 : index
    %c0_24 = arith.constant 0 : index
    %113 = vector.load %arg2[%c24, %c0_24] : memref<104x128xf32, #tpu.memory_space<vmem>>, vector<8x128xf32>
    %114 = vector.extract_strided_slice %113 {offsets = [0, 0], sizes = [8, 72], strides = [1, 1]} : vector<8x128xf32> to vector<8x72xf32>
    %115 = vector.extract_strided_slice %113 {offsets = [0, 72], sizes = [8, 1], strides = [1, 1]} : vector<8x128xf32> to vector<8x1xf32>
    %116 = arith.negf %112 : vector<8x128xf32>
    %117 = math.exp %116 : vector<8x128xf32>
    %cst_25 = arith.constant 1.000000e+00 : f32
    %118 = vector.broadcast %cst_25 : f32 to vector<8x128xf32>
    %119 = arith.addf %118, %117 : vector<8x128xf32>
    %120 = arith.divf %118, %119 : vector<8x128xf32>
    %121 = arith.mulf %112, %120 : vector<8x128xf32>
    %122 = vector.extract_strided_slice %121 {offsets = [0, 119], sizes = [8, 9], strides = [1, 1]} : vector<8x128xf32> to vector<8x9xf32>
    %123 = vector.extract_strided_slice %121 {offsets = [0, 0], sizes = [8, 119], strides = [1, 1]} : vector<8x128xf32> to vector<8x119xf32>
    %124 = tpu.concatenate %122, %123 in 1 : vector<8x9xf32>, vector<8x119xf32> -> vector<8x128xf32>
    %125 = arith.andi %19, %23 : vector<8x128xi1>
    %cst_26 = arith.constant 0.000000e+00 : f32
    %126 = vector.broadcast %cst_26 : f32 to vector<8x128xf32>
    %127 = arith.select %125, %124, %126 : vector<8x128xi1>, vector<8x128xf32>
    %128 = vector.extract_strided_slice %121 {offsets = [0, 120], sizes = [8, 8], strides = [1, 1]} : vector<8x128xf32> to vector<8x8xf32>
    %129 = vector.extract_strided_slice %121 {offsets = [0, 0], sizes = [8, 120], strides = [1, 1]} : vector<8x128xf32> to vector<8x120xf32>
    %130 = tpu.concatenate %128, %129 in 1 : vector<8x8xf32>, vector<8x120xf32> -> vector<8x128xf32>
    %cst_27 = arith.constant 0.000000e+00 : f32
    %131 = vector.broadcast %cst_27 : f32 to vector<8x128xf32>
    %132 = arith.select %19, %130, %131 : vector<8x128xi1>, vector<8x128xf32>
    %133 = vector.extract_strided_slice %121 {offsets = [0, 121], sizes = [8, 7], strides = [1, 1]} : vector<8x128xf32> to vector<8x7xf32>
    %134 = vector.extract_strided_slice %121 {offsets = [0, 0], sizes = [8, 121], strides = [1, 1]} : vector<8x128xf32> to vector<8x121xf32>
    %135 = tpu.concatenate %133, %134 in 1 : vector<8x7xf32>, vector<8x121xf32> -> vector<8x128xf32>
    %136 = arith.andi %19, %25 : vector<8x128xi1>
    %cst_28 = arith.constant 0.000000e+00 : f32
    %137 = vector.broadcast %cst_28 : f32 to vector<8x128xf32>
    %138 = arith.select %136, %135, %137 : vector<8x128xi1>, vector<8x128xf32>
    %139 = vector.extract_strided_slice %121 {offsets = [0, 127], sizes = [8, 1], strides = [1, 1]} : vector<8x128xf32> to vector<8x1xf32>
    %140 = vector.extract_strided_slice %121 {offsets = [0, 0], sizes = [8, 127], strides = [1, 1]} : vector<8x128xf32> to vector<8x127xf32>
    %141 = tpu.concatenate %139, %140 in 1 : vector<8x1xf32>, vector<8x127xf32> -> vector<8x128xf32>
    %cst_29 = arith.constant 0.000000e+00 : f32
    %142 = vector.broadcast %cst_29 : f32 to vector<8x128xf32>
    %143 = arith.select %23, %141, %142 : vector<8x128xi1>, vector<8x128xf32>
    %144 = vector.extract_strided_slice %121 {offsets = [0, 1], sizes = [8, 127], strides = [1, 1]} : vector<8x128xf32> to vector<8x127xf32>
    %145 = vector.extract_strided_slice %121 {offsets = [0, 0], sizes = [8, 1], strides = [1, 1]} : vector<8x128xf32> to vector<8x1xf32>
    %146 = tpu.concatenate %144, %145 in 1 : vector<8x127xf32>, vector<8x1xf32> -> vector<8x128xf32>
    %cst_30 = arith.constant 0.000000e+00 : f32
    %147 = vector.broadcast %cst_30 : f32 to vector<8x128xf32>
    %148 = arith.select %25, %146, %147 : vector<8x128xi1>, vector<8x128xf32>
    %149 = vector.extract_strided_slice %121 {offsets = [0, 7], sizes = [8, 121], strides = [1, 1]} : vector<8x128xf32> to vector<8x121xf32>
    %150 = vector.extract_strided_slice %121 {offsets = [0, 0], sizes = [8, 7], strides = [1, 1]} : vector<8x128xf32> to vector<8x7xf32>
    %151 = tpu.concatenate %149, %150 in 1 : vector<8x121xf32>, vector<8x7xf32> -> vector<8x128xf32>
    %152 = arith.andi %21, %23 : vector<8x128xi1>
    %cst_31 = arith.constant 0.000000e+00 : f32
    %153 = vector.broadcast %cst_31 : f32 to vector<8x128xf32>
    %154 = arith.select %152, %151, %153 : vector<8x128xi1>, vector<8x128xf32>
    %155 = vector.extract_strided_slice %121 {offsets = [0, 8], sizes = [8, 120], strides = [1, 1]} : vector<8x128xf32> to vector<8x120xf32>
    %156 = vector.extract_strided_slice %121 {offsets = [0, 0], sizes = [8, 8], strides = [1, 1]} : vector<8x128xf32> to vector<8x8xf32>
    %157 = tpu.concatenate %155, %156 in 1 : vector<8x120xf32>, vector<8x8xf32> -> vector<8x128xf32>
    %cst_32 = arith.constant 0.000000e+00 : f32
    %158 = vector.broadcast %cst_32 : f32 to vector<8x128xf32>
    %159 = arith.select %21, %157, %158 : vector<8x128xi1>, vector<8x128xf32>
    %160 = vector.extract_strided_slice %121 {offsets = [0, 9], sizes = [8, 119], strides = [1, 1]} : vector<8x128xf32> to vector<8x119xf32>
    %161 = vector.extract_strided_slice %121 {offsets = [0, 0], sizes = [8, 9], strides = [1, 1]} : vector<8x128xf32> to vector<8x9xf32>
    %162 = tpu.concatenate %160, %161 in 1 : vector<8x119xf32>, vector<8x9xf32> -> vector<8x128xf32>
    %163 = arith.andi %21, %25 : vector<8x128xi1>
    %cst_33 = arith.constant 0.000000e+00 : f32
    %164 = vector.broadcast %cst_33 : f32 to vector<8x128xf32>
    %165 = arith.select %163, %162, %164 : vector<8x128xi1>, vector<8x128xf32>
    %166 = tpu.concatenate %127, %132, %138, %143, %121, %148, %154, %159, %165 in 0 : vector<8x128xf32>, vector<8x128xf32>, vector<8x128xf32>, vector<8x128xf32>, vector<8x128xf32>, vector<8x128xf32>, vector<8x128xf32>, vector<8x128xf32>, vector<8x128xf32> -> vector<72x128xf32>
    %167 = arith.truncf %114 : vector<8x72xf32> to vector<8x72xbf16>
    %168 = arith.truncf %166 : vector<72x128xf32> to vector<72x128xbf16>
    %cst_34 = arith.constant dense<0.000000e+00> : vector<8x128xf32>
    %169 = tpu.matmul %167, %168, %cst_34 {dimension_numbers = #tpu.dot_dimension_numbers<[1], [0], [0], [1], [0, 0, 1, 1], [], []>} : vector<8x72xbf16>, vector<72x128xbf16>, vector<8x128xf32> -> vector<8x128xf32>
    %170 = vector.broadcast %115 : vector<8x1xf32> to vector<8x128xf32>
    %171 = arith.addf %169, %170 : vector<8x128xf32>
    %172 = arith.addf %112, %171 : vector<8x128xf32>
    %c32 = arith.constant 32 : index
    %c0_35 = arith.constant 0 : index
    %173 = vector.load %arg2[%c32, %c0_35] : memref<104x128xf32, #tpu.memory_space<vmem>>, vector<8x128xf32>
    %174 = vector.extract_strided_slice %173 {offsets = [0, 0], sizes = [8, 8], strides = [1, 1]} : vector<8x128xf32> to vector<8x8xf32>
    %cst_36 = arith.constant 0.000000e+00 : f32
    %175 = vector.broadcast %cst_36 : f32 to vector<8x128xf32>
    %176 = arith.cmpf ogt, %172, %175 : vector<8x128xf32>
    %cst_37 = arith.constant 0.000000e+00 : f32
    %177 = vector.broadcast %cst_37 : f32 to vector<8x128xf32>
    %178 = arith.minimumf %172, %177 : vector<8x128xf32>
    %179 = math.exp %178 : vector<8x128xf32>
    %cst_38 = arith.constant 1.000000e+00 : f32
    %180 = vector.broadcast %cst_38 : f32 to vector<8x128xf32>
    %181 = arith.subf %179, %180 : vector<8x128xf32>
    %182 = arith.select %176, %172, %181 : vector<8x128xi1>, vector<8x128xf32>
    %cst_39 = arith.constant dense<0.000000e+00> : vector<8x128xf32>
    %183 = tpu.matmul %174, %182, %cst_39 {dimension_numbers = #tpu.dot_dimension_numbers<[1], [0], [0], [1], [0, 0, 1, 1], [], []>} : vector<8x8xf32>, vector<8x128xf32>, vector<8x128xf32> -> vector<8x128xf32>
    %184 = vector.extract_strided_slice %173 {offsets = [0, 8], sizes = [8, 1], strides = [1, 1]} : vector<8x128xf32> to vector<8x1xf32>
    %185 = vector.broadcast %184 : vector<8x1xf32> to vector<8x128xf32>
    %186 = arith.addf %183, %185 : vector<8x128xf32>
    %187 = vector.extract_strided_slice %186 {offsets = [0, 0], sizes = [4, 128], strides = [1, 1]} : vector<8x128xf32> to vector<4x128xf32>
    %c40 = arith.constant 40 : index
    %c0_40 = arith.constant 0 : index
    %188 = vector.load %arg2[%c40, %c0_40] : memref<104x128xf32, #tpu.memory_space<vmem>>, vector<8x128xf32>
    %189 = vector.extract_strided_slice %188 {offsets = [0, 0], sizes = [8, 8], strides = [1, 1]} : vector<8x128xf32> to vector<8x8xf32>
    %190 = vector.extract_strided_slice %188 {offsets = [0, 8], sizes = [8, 4], strides = [1, 1]} : vector<8x128xf32> to vector<8x4xf32>
    %191 = vector.extract_strided_slice %188 {offsets = [0, 12], sizes = [8, 1], strides = [1, 1]} : vector<8x128xf32> to vector<8x1xf32>
    %cst_41 = arith.constant dense<0.000000e+00> : vector<8x128xf32>
    %192 = tpu.matmul %189, %172, %cst_41 {dimension_numbers = #tpu.dot_dimension_numbers<[1], [0], [0], [1], [0, 0, 1, 1], [], []>} : vector<8x8xf32>, vector<8x128xf32>, vector<8x128xf32> -> vector<8x128xf32>
    %cst_42 = arith.constant dense<0.000000e+00> : vector<8x128xf32>
    %193 = tpu.matmul %190, %187, %cst_42 {dimension_numbers = #tpu.dot_dimension_numbers<[1], [0], [0], [1], [0, 0, 1, 1], [], []>} : vector<8x4xf32>, vector<4x128xf32>, vector<8x128xf32> -> vector<8x128xf32>
    %194 = arith.addf %192, %193 : vector<8x128xf32>
    %195 = vector.broadcast %191 : vector<8x1xf32> to vector<8x128xf32>
    %196 = arith.addf %194, %195 : vector<8x128xf32>
    %c48 = arith.constant 48 : index
    %c0_43 = arith.constant 0 : index
    %197 = vector.load %arg2[%c48, %c0_43] : memref<104x128xf32, #tpu.memory_space<vmem>>, vector<8x128xf32>
    %198 = vector.extract_strided_slice %197 {offsets = [0, 0], sizes = [8, 72], strides = [1, 1]} : vector<8x128xf32> to vector<8x72xf32>
    %199 = vector.extract_strided_slice %197 {offsets = [0, 72], sizes = [8, 1], strides = [1, 1]} : vector<8x128xf32> to vector<8x1xf32>
    %200 = arith.negf %196 : vector<8x128xf32>
    %201 = math.exp %200 : vector<8x128xf32>
    %cst_44 = arith.constant 1.000000e+00 : f32
    %202 = vector.broadcast %cst_44 : f32 to vector<8x128xf32>
    %203 = arith.addf %202, %201 : vector<8x128xf32>
    %204 = arith.divf %202, %203 : vector<8x128xf32>
    %205 = arith.mulf %196, %204 : vector<8x128xf32>
    %206 = vector.extract_strided_slice %205 {offsets = [0, 119], sizes = [8, 9], strides = [1, 1]} : vector<8x128xf32> to vector<8x9xf32>
    %207 = vector.extract_strided_slice %205 {offsets = [0, 0], sizes = [8, 119], strides = [1, 1]} : vector<8x128xf32> to vector<8x119xf32>
    %208 = tpu.concatenate %206, %207 in 1 : vector<8x9xf32>, vector<8x119xf32> -> vector<8x128xf32>
    %209 = arith.andi %19, %23 : vector<8x128xi1>
    %cst_45 = arith.constant 0.000000e+00 : f32
    %210 = vector.broadcast %cst_45 : f32 to vector<8x128xf32>
    %211 = arith.select %209, %208, %210 : vector<8x128xi1>, vector<8x128xf32>
    %212 = vector.extract_strided_slice %205 {offsets = [0, 120], sizes = [8, 8], strides = [1, 1]} : vector<8x128xf32> to vector<8x8xf32>
    %213 = vector.extract_strided_slice %205 {offsets = [0, 0], sizes = [8, 120], strides = [1, 1]} : vector<8x128xf32> to vector<8x120xf32>
    %214 = tpu.concatenate %212, %213 in 1 : vector<8x8xf32>, vector<8x120xf32> -> vector<8x128xf32>
    %cst_46 = arith.constant 0.000000e+00 : f32
    %215 = vector.broadcast %cst_46 : f32 to vector<8x128xf32>
    %216 = arith.select %19, %214, %215 : vector<8x128xi1>, vector<8x128xf32>
    %217 = vector.extract_strided_slice %205 {offsets = [0, 121], sizes = [8, 7], strides = [1, 1]} : vector<8x128xf32> to vector<8x7xf32>
    %218 = vector.extract_strided_slice %205 {offsets = [0, 0], sizes = [8, 121], strides = [1, 1]} : vector<8x128xf32> to vector<8x121xf32>
    %219 = tpu.concatenate %217, %218 in 1 : vector<8x7xf32>, vector<8x121xf32> -> vector<8x128xf32>
    %220 = arith.andi %19, %25 : vector<8x128xi1>
    %cst_47 = arith.constant 0.000000e+00 : f32
    %221 = vector.broadcast %cst_47 : f32 to vector<8x128xf32>
    %222 = arith.select %220, %219, %221 : vector<8x128xi1>, vector<8x128xf32>
    %223 = vector.extract_strided_slice %205 {offsets = [0, 127], sizes = [8, 1], strides = [1, 1]} : vector<8x128xf32> to vector<8x1xf32>
    %224 = vector.extract_strided_slice %205 {offsets = [0, 0], sizes = [8, 127], strides = [1, 1]} : vector<8x128xf32> to vector<8x127xf32>
    %225 = tpu.concatenate %223, %224 in 1 : vector<8x1xf32>, vector<8x127xf32> -> vector<8x128xf32>
    %cst_48 = arith.constant 0.000000e+00 : f32
    %226 = vector.broadcast %cst_48 : f32 to vector<8x128xf32>
    %227 = arith.select %23, %225, %226 : vector<8x128xi1>, vector<8x128xf32>
    %228 = vector.extract_strided_slice %205 {offsets = [0, 1], sizes = [8, 127], strides = [1, 1]} : vector<8x128xf32> to vector<8x127xf32>
    %229 = vector.extract_strided_slice %205 {offsets = [0, 0], sizes = [8, 1], strides = [1, 1]} : vector<8x128xf32> to vector<8x1xf32>
    %230 = tpu.concatenate %228, %229 in 1 : vector<8x127xf32>, vector<8x1xf32> -> vector<8x128xf32>
    %cst_49 = arith.constant 0.000000e+00 : f32
    %231 = vector.broadcast %cst_49 : f32 to vector<8x128xf32>
    %232 = arith.select %25, %230, %231 : vector<8x128xi1>, vector<8x128xf32>
    %233 = vector.extract_strided_slice %205 {offsets = [0, 7], sizes = [8, 121], strides = [1, 1]} : vector<8x128xf32> to vector<8x121xf32>
    %234 = vector.extract_strided_slice %205 {offsets = [0, 0], sizes = [8, 7], strides = [1, 1]} : vector<8x128xf32> to vector<8x7xf32>
    %235 = tpu.concatenate %233, %234 in 1 : vector<8x121xf32>, vector<8x7xf32> -> vector<8x128xf32>
    %236 = arith.andi %21, %23 : vector<8x128xi1>
    %cst_50 = arith.constant 0.000000e+00 : f32
    %237 = vector.broadcast %cst_50 : f32 to vector<8x128xf32>
    %238 = arith.select %236, %235, %237 : vector<8x128xi1>, vector<8x128xf32>
    %239 = vector.extract_strided_slice %205 {offsets = [0, 8], sizes = [8, 120], strides = [1, 1]} : vector<8x128xf32> to vector<8x120xf32>
    %240 = vector.extract_strided_slice %205 {offsets = [0, 0], sizes = [8, 8], strides = [1, 1]} : vector<8x128xf32> to vector<8x8xf32>
    %241 = tpu.concatenate %239, %240 in 1 : vector<8x120xf32>, vector<8x8xf32> -> vector<8x128xf32>
    %cst_51 = arith.constant 0.000000e+00 : f32
    %242 = vector.broadcast %cst_51 : f32 to vector<8x128xf32>
    %243 = arith.select %21, %241, %242 : vector<8x128xi1>, vector<8x128xf32>
    %244 = vector.extract_strided_slice %205 {offsets = [0, 9], sizes = [8, 119], strides = [1, 1]} : vector<8x128xf32> to vector<8x119xf32>
    %245 = vector.extract_strided_slice %205 {offsets = [0, 0], sizes = [8, 9], strides = [1, 1]} : vector<8x128xf32> to vector<8x9xf32>
    %246 = tpu.concatenate %244, %245 in 1 : vector<8x119xf32>, vector<8x9xf32> -> vector<8x128xf32>
    %247 = arith.andi %21, %25 : vector<8x128xi1>
    %cst_52 = arith.constant 0.000000e+00 : f32
    %248 = vector.broadcast %cst_52 : f32 to vector<8x128xf32>
    %249 = arith.select %247, %246, %248 : vector<8x128xi1>, vector<8x128xf32>
    %250 = tpu.concatenate %211, %216, %222, %227, %205, %232, %238, %243, %249 in 0 : vector<8x128xf32>, vector<8x128xf32>, vector<8x128xf32>, vector<8x128xf32>, vector<8x128xf32>, vector<8x128xf32>, vector<8x128xf32>, vector<8x128xf32>, vector<8x128xf32> -> vector<72x128xf32>
    %251 = arith.truncf %198 : vector<8x72xf32> to vector<8x72xbf16>
    %252 = arith.truncf %250 : vector<72x128xf32> to vector<72x128xbf16>
    %cst_53 = arith.constant dense<0.000000e+00> : vector<8x128xf32>
    %253 = tpu.matmul %251, %252, %cst_53 {dimension_numbers = #tpu.dot_dimension_numbers<[1], [0], [0], [1], [0, 0, 1, 1], [], []>} : vector<8x72xbf16>, vector<72x128xbf16>, vector<8x128xf32> -> vector<8x128xf32>
    %254 = vector.broadcast %199 : vector<8x1xf32> to vector<8x128xf32>
    %255 = arith.addf %253, %254 : vector<8x128xf32>
    %256 = arith.addf %196, %255 : vector<8x128xf32>
    %c0_54 = arith.constant 0 : index
    %c0_55 = arith.constant 0 : index
    %257 = vector.load %arg3[%c0_54, %c0_55] : memref<128x512xf32, #tpu.memory_space<vmem>>, vector<128x512xf32>
    %cst_56 = arith.constant dense<0.000000e+00> : vector<8x512xf32>
    %258 = tpu.matmul %256, %257, %cst_56 {dimension_numbers = #tpu.dot_dimension_numbers<[1], [0], [0], [1], [0, 0, 1, 1], [], []>} : vector<8x128xf32>, vector<128x512xf32>, vector<8x512xf32> -> vector<8x512xf32>
    %c56 = arith.constant 56 : index
    %c0_57 = arith.constant 0 : index
    %259 = vector.load %arg2[%c56, %c0_57] : memref<104x128xf32, #tpu.memory_space<vmem>>, vector<8x128xf32>
    %260 = vector.extract_strided_slice %259 {offsets = [0, 0], sizes = [8, 72], strides = [1, 1]} : vector<8x128xf32> to vector<8x72xf32>
    %261 = vector.extract_strided_slice %259 {offsets = [0, 72], sizes = [8, 1], strides = [1, 1]} : vector<8x128xf32> to vector<8x1xf32>
    %262 = arith.negf %258 : vector<8x512xf32>
    %263 = math.exp %262 : vector<8x512xf32>
    %cst_58 = arith.constant 1.000000e+00 : f32
    %264 = vector.broadcast %cst_58 : f32 to vector<8x512xf32>
    %265 = arith.addf %264, %263 : vector<8x512xf32>
    %266 = arith.divf %264, %265 : vector<8x512xf32>
    %267 = arith.mulf %258, %266 : vector<8x512xf32>
    %268 = vector.extract_strided_slice %267 {offsets = [0, 495], sizes = [8, 17], strides = [1, 1]} : vector<8x512xf32> to vector<8x17xf32>
    %269 = vector.extract_strided_slice %267 {offsets = [0, 0], sizes = [8, 495], strides = [1, 1]} : vector<8x512xf32> to vector<8x495xf32>
    %270 = tpu.concatenate %268, %269 in 1 : vector<8x17xf32>, vector<8x495xf32> -> vector<8x512xf32>
    %271 = arith.andi %32, %36 : vector<8x512xi1>
    %cst_59 = arith.constant 0.000000e+00 : f32
    %272 = vector.broadcast %cst_59 : f32 to vector<8x512xf32>
    %273 = arith.select %271, %270, %272 : vector<8x512xi1>, vector<8x512xf32>
    %274 = vector.extract_strided_slice %267 {offsets = [0, 496], sizes = [8, 16], strides = [1, 1]} : vector<8x512xf32> to vector<8x16xf32>
    %275 = vector.extract_strided_slice %267 {offsets = [0, 0], sizes = [8, 496], strides = [1, 1]} : vector<8x512xf32> to vector<8x496xf32>
    %276 = tpu.concatenate %274, %275 in 1 : vector<8x16xf32>, vector<8x496xf32> -> vector<8x512xf32>
    %cst_60 = arith.constant 0.000000e+00 : f32
    %277 = vector.broadcast %cst_60 : f32 to vector<8x512xf32>
    %278 = arith.select %32, %276, %277 : vector<8x512xi1>, vector<8x512xf32>
    %279 = vector.extract_strided_slice %267 {offsets = [0, 497], sizes = [8, 15], strides = [1, 1]} : vector<8x512xf32> to vector<8x15xf32>
    %280 = vector.extract_strided_slice %267 {offsets = [0, 0], sizes = [8, 497], strides = [1, 1]} : vector<8x512xf32> to vector<8x497xf32>
    %281 = tpu.concatenate %279, %280 in 1 : vector<8x15xf32>, vector<8x497xf32> -> vector<8x512xf32>
    %282 = arith.andi %32, %38 : vector<8x512xi1>
    %cst_61 = arith.constant 0.000000e+00 : f32
    %283 = vector.broadcast %cst_61 : f32 to vector<8x512xf32>
    %284 = arith.select %282, %281, %283 : vector<8x512xi1>, vector<8x512xf32>
    %285 = vector.extract_strided_slice %267 {offsets = [0, 511], sizes = [8, 1], strides = [1, 1]} : vector<8x512xf32> to vector<8x1xf32>
    %286 = vector.extract_strided_slice %267 {offsets = [0, 0], sizes = [8, 511], strides = [1, 1]} : vector<8x512xf32> to vector<8x511xf32>
    %287 = tpu.concatenate %285, %286 in 1 : vector<8x1xf32>, vector<8x511xf32> -> vector<8x512xf32>
    %cst_62 = arith.constant 0.000000e+00 : f32
    %288 = vector.broadcast %cst_62 : f32 to vector<8x512xf32>
    %289 = arith.select %36, %287, %288 : vector<8x512xi1>, vector<8x512xf32>
    %290 = vector.extract_strided_slice %267 {offsets = [0, 1], sizes = [8, 511], strides = [1, 1]} : vector<8x512xf32> to vector<8x511xf32>
    %291 = vector.extract_strided_slice %267 {offsets = [0, 0], sizes = [8, 1], strides = [1, 1]} : vector<8x512xf32> to vector<8x1xf32>
    %292 = tpu.concatenate %290, %291 in 1 : vector<8x511xf32>, vector<8x1xf32> -> vector<8x512xf32>
    %cst_63 = arith.constant 0.000000e+00 : f32
    %293 = vector.broadcast %cst_63 : f32 to vector<8x512xf32>
    %294 = arith.select %38, %292, %293 : vector<8x512xi1>, vector<8x512xf32>
    %295 = vector.extract_strided_slice %267 {offsets = [0, 15], sizes = [8, 497], strides = [1, 1]} : vector<8x512xf32> to vector<8x497xf32>
    %296 = vector.extract_strided_slice %267 {offsets = [0, 0], sizes = [8, 15], strides = [1, 1]} : vector<8x512xf32> to vector<8x15xf32>
    %297 = tpu.concatenate %295, %296 in 1 : vector<8x497xf32>, vector<8x15xf32> -> vector<8x512xf32>
    %298 = arith.andi %34, %36 : vector<8x512xi1>
    %cst_64 = arith.constant 0.000000e+00 : f32
    %299 = vector.broadcast %cst_64 : f32 to vector<8x512xf32>
    %300 = arith.select %298, %297, %299 : vector<8x512xi1>, vector<8x512xf32>
    %301 = vector.extract_strided_slice %267 {offsets = [0, 16], sizes = [8, 496], strides = [1, 1]} : vector<8x512xf32> to vector<8x496xf32>
    %302 = vector.extract_strided_slice %267 {offsets = [0, 0], sizes = [8, 16], strides = [1, 1]} : vector<8x512xf32> to vector<8x16xf32>
    %303 = tpu.concatenate %301, %302 in 1 : vector<8x496xf32>, vector<8x16xf32> -> vector<8x512xf32>
    %cst_65 = arith.constant 0.000000e+00 : f32
    %304 = vector.broadcast %cst_65 : f32 to vector<8x512xf32>
    %305 = arith.select %34, %303, %304 : vector<8x512xi1>, vector<8x512xf32>
    %306 = vector.extract_strided_slice %267 {offsets = [0, 17], sizes = [8, 495], strides = [1, 1]} : vector<8x512xf32> to vector<8x495xf32>
    %307 = vector.extract_strided_slice %267 {offsets = [0, 0], sizes = [8, 17], strides = [1, 1]} : vector<8x512xf32> to vector<8x17xf32>
    %308 = tpu.concatenate %306, %307 in 1 : vector<8x495xf32>, vector<8x17xf32> -> vector<8x512xf32>
    %309 = arith.andi %34, %38 : vector<8x512xi1>
    %cst_66 = arith.constant 0.000000e+00 : f32
    %310 = vector.broadcast %cst_66 : f32 to vector<8x512xf32>
    %311 = arith.select %309, %308, %310 : vector<8x512xi1>, vector<8x512xf32>
    %312 = tpu.concatenate %273, %278, %284, %289, %267, %294, %300, %305, %311 in 0 : vector<8x512xf32>, vector<8x512xf32>, vector<8x512xf32>, vector<8x512xf32>, vector<8x512xf32>, vector<8x512xf32>, vector<8x512xf32>, vector<8x512xf32>, vector<8x512xf32> -> vector<72x512xf32>
    %313 = arith.truncf %260 : vector<8x72xf32> to vector<8x72xbf16>
    %314 = arith.truncf %312 : vector<72x512xf32> to vector<72x512xbf16>
    %cst_67 = arith.constant dense<0.000000e+00> : vector<8x512xf32>
    %315 = tpu.matmul %313, %314, %cst_67 {dimension_numbers = #tpu.dot_dimension_numbers<[1], [0], [0], [1], [0, 0, 1, 1], [], []>} : vector<8x72xbf16>, vector<72x512xbf16>, vector<8x512xf32> -> vector<8x512xf32>
    %316 = vector.broadcast %261 : vector<8x1xf32> to vector<8x512xf32>
    %317 = arith.addf %315, %316 : vector<8x512xf32>
    %318 = arith.addf %258, %317 : vector<8x512xf32>
    %c64 = arith.constant 64 : index
    %c0_68 = arith.constant 0 : index
    %319 = vector.load %arg2[%c64, %c0_68] : memref<104x128xf32, #tpu.memory_space<vmem>>, vector<8x128xf32>
    %320 = vector.extract_strided_slice %319 {offsets = [0, 0], sizes = [3, 72], strides = [1, 1]} : vector<8x128xf32> to vector<3x72xf32>
    %321 = vector.extract_strided_slice %319 {offsets = [0, 72], sizes = [3, 1], strides = [1, 1]} : vector<8x128xf32> to vector<3x1xf32>
    %cst_69 = arith.constant 0.000000e+00 : f32
    %322 = vector.broadcast %cst_69 : f32 to vector<8x512xf32>
    %323 = arith.cmpf ogt, %318, %322 : vector<8x512xf32>
    %cst_70 = arith.constant 0.000000e+00 : f32
    %324 = vector.broadcast %cst_70 : f32 to vector<8x512xf32>
    %325 = arith.minimumf %318, %324 : vector<8x512xf32>
    %326 = math.exp %325 : vector<8x512xf32>
    %cst_71 = arith.constant 1.000000e+00 : f32
    %327 = vector.broadcast %cst_71 : f32 to vector<8x512xf32>
    %328 = arith.subf %326, %327 : vector<8x512xf32>
    %329 = arith.select %323, %318, %328 : vector<8x512xi1>, vector<8x512xf32>
    %330 = vector.extract_strided_slice %329 {offsets = [0, 495], sizes = [8, 17], strides = [1, 1]} : vector<8x512xf32> to vector<8x17xf32>
    %331 = vector.extract_strided_slice %329 {offsets = [0, 0], sizes = [8, 495], strides = [1, 1]} : vector<8x512xf32> to vector<8x495xf32>
    %332 = tpu.concatenate %330, %331 in 1 : vector<8x17xf32>, vector<8x495xf32> -> vector<8x512xf32>
    %333 = arith.andi %32, %36 : vector<8x512xi1>
    %cst_72 = arith.constant 0.000000e+00 : f32
    %334 = vector.broadcast %cst_72 : f32 to vector<8x512xf32>
    %335 = arith.select %333, %332, %334 : vector<8x512xi1>, vector<8x512xf32>
    %336 = vector.extract_strided_slice %329 {offsets = [0, 496], sizes = [8, 16], strides = [1, 1]} : vector<8x512xf32> to vector<8x16xf32>
    %337 = vector.extract_strided_slice %329 {offsets = [0, 0], sizes = [8, 496], strides = [1, 1]} : vector<8x512xf32> to vector<8x496xf32>
    %338 = tpu.concatenate %336, %337 in 1 : vector<8x16xf32>, vector<8x496xf32> -> vector<8x512xf32>
    %cst_73 = arith.constant 0.000000e+00 : f32
    %339 = vector.broadcast %cst_73 : f32 to vector<8x512xf32>
    %340 = arith.select %32, %338, %339 : vector<8x512xi1>, vector<8x512xf32>
    %341 = vector.extract_strided_slice %329 {offsets = [0, 497], sizes = [8, 15], strides = [1, 1]} : vector<8x512xf32> to vector<8x15xf32>
    %342 = vector.extract_strided_slice %329 {offsets = [0, 0], sizes = [8, 497], strides = [1, 1]} : vector<8x512xf32> to vector<8x497xf32>
    %343 = tpu.concatenate %341, %342 in 1 : vector<8x15xf32>, vector<8x497xf32> -> vector<8x512xf32>
    %344 = arith.andi %32, %38 : vector<8x512xi1>
    %cst_74 = arith.constant 0.000000e+00 : f32
    %345 = vector.broadcast %cst_74 : f32 to vector<8x512xf32>
    %346 = arith.select %344, %343, %345 : vector<8x512xi1>, vector<8x512xf32>
    %347 = vector.extract_strided_slice %329 {offsets = [0, 511], sizes = [8, 1], strides = [1, 1]} : vector<8x512xf32> to vector<8x1xf32>
    %348 = vector.extract_strided_slice %329 {offsets = [0, 0], sizes = [8, 511], strides = [1, 1]} : vector<8x512xf32> to vector<8x511xf32>
    %349 = tpu.concatenate %347, %348 in 1 : vector<8x1xf32>, vector<8x511xf32> -> vector<8x512xf32>
    %cst_75 = arith.constant 0.000000e+00 : f32
    %350 = vector.broadcast %cst_75 : f32 to vector<8x512xf32>
    %351 = arith.select %36, %349, %350 : vector<8x512xi1>, vector<8x512xf32>
    %352 = vector.extract_strided_slice %329 {offsets = [0, 1], sizes = [8, 511], strides = [1, 1]} : vector<8x512xf32> to vector<8x511xf32>
    %353 = vector.extract_strided_slice %329 {offsets = [0, 0], sizes = [8, 1], strides = [1, 1]} : vector<8x512xf32> to vector<8x1xf32>
    %354 = tpu.concatenate %352, %353 in 1 : vector<8x511xf32>, vector<8x1xf32> -> vector<8x512xf32>
    %cst_76 = arith.constant 0.000000e+00 : f32
    %355 = vector.broadcast %cst_76 : f32 to vector<8x512xf32>
    %356 = arith.select %38, %354, %355 : vector<8x512xi1>, vector<8x512xf32>
    %357 = vector.extract_strided_slice %329 {offsets = [0, 15], sizes = [8, 497], strides = [1, 1]} : vector<8x512xf32> to vector<8x497xf32>
    %358 = vector.extract_strided_slice %329 {offsets = [0, 0], sizes = [8, 15], strides = [1, 1]} : vector<8x512xf32> to vector<8x15xf32>
    %359 = tpu.concatenate %357, %358 in 1 : vector<8x497xf32>, vector<8x15xf32> -> vector<8x512xf32>
    %360 = arith.andi %34, %36 : vector<8x512xi1>
    %cst_77 = arith.constant 0.000000e+00 : f32
    %361 = vector.broadcast %cst_77 : f32 to vector<8x512xf32>
    %362 = arith.select %360, %359, %361 : vector<8x512xi1>, vector<8x512xf32>
    %363 = vector.extract_strided_slice %329 {offsets = [0, 16], sizes = [8, 496], strides = [1, 1]} : vector<8x512xf32> to vector<8x496xf32>
    %364 = vector.extract_strided_slice %329 {offsets = [0, 0], sizes = [8, 16], strides = [1, 1]} : vector<8x512xf32> to vector<8x16xf32>
    %365 = tpu.concatenate %363, %364 in 1 : vector<8x496xf32>, vector<8x16xf32> -> vector<8x512xf32>
    %cst_78 = arith.constant 0.000000e+00 : f32
    %366 = vector.broadcast %cst_78 : f32 to vector<8x512xf32>
    %367 = arith.select %34, %365, %366 : vector<8x512xi1>, vector<8x512xf32>
    %368 = vector.extract_strided_slice %329 {offsets = [0, 17], sizes = [8, 495], strides = [1, 1]} : vector<8x512xf32> to vector<8x495xf32>
    %369 = vector.extract_strided_slice %329 {offsets = [0, 0], sizes = [8, 17], strides = [1, 1]} : vector<8x512xf32> to vector<8x17xf32>
    %370 = tpu.concatenate %368, %369 in 1 : vector<8x495xf32>, vector<8x17xf32> -> vector<8x512xf32>
    %371 = arith.andi %34, %38 : vector<8x512xi1>
    %cst_79 = arith.constant 0.000000e+00 : f32
    %372 = vector.broadcast %cst_79 : f32 to vector<8x512xf32>
    %373 = arith.select %371, %370, %372 : vector<8x512xi1>, vector<8x512xf32>
    %374 = tpu.concatenate %335, %340, %346, %351, %329, %356, %362, %367, %373 in 0 : vector<8x512xf32>, vector<8x512xf32>, vector<8x512xf32>, vector<8x512xf32>, vector<8x512xf32>, vector<8x512xf32>, vector<8x512xf32>, vector<8x512xf32>, vector<8x512xf32> -> vector<72x512xf32>
    %375 = arith.truncf %320 : vector<3x72xf32> to vector<3x72xbf16>
    %376 = arith.truncf %374 : vector<72x512xf32> to vector<72x512xbf16>
    %cst_80 = arith.constant dense<0.000000e+00> : vector<3x512xf32>
    %377 = tpu.matmul %375, %376, %cst_80 {dimension_numbers = #tpu.dot_dimension_numbers<[1], [0], [0], [1], [0, 0, 1, 1], [], []>} : vector<3x72xbf16>, vector<72x512xbf16>, vector<3x512xf32> -> vector<3x512xf32>
    %378 = vector.broadcast %321 : vector<3x1xf32> to vector<3x512xf32>
    %379 = arith.addf %377, %378 : vector<3x512xf32>
    %380 = arith.negf %379 : vector<3x512xf32>
    %381 = math.exp %380 : vector<3x512xf32>
    %cst_81 = arith.constant 1.000000e+00 : f32
    %382 = vector.broadcast %cst_81 : f32 to vector<3x512xf32>
    %383 = arith.addf %382, %381 : vector<3x512xf32>
    %384 = arith.divf %382, %383 : vector<3x512xf32>
    %cst_82 = arith.constant 2.000000e+00 : f32
    %385 = vector.broadcast %cst_82 : f32 to vector<3x512xf32>
    %386 = arith.mulf %384, %385 : vector<3x512xf32>
    %cst_83 = arith.constant 1.000000e+00 : f32
    %387 = vector.broadcast %cst_83 : f32 to vector<3x512xf32>
    %388 = arith.subf %386, %387 : vector<3x512xf32>
    %389 = vector.extract_strided_slice %388 {offsets = [0, 0], sizes = [3, 256], strides = [1, 1]} : vector<3x512xf32> to vector<3x256xf32>
    %c0_84 = arith.constant 0 : index
    %c0_85 = arith.constant 0 : index
    %c0_86 = arith.constant 0 : index
    %390 = vector.load %arg4[%c0_84, %c0_85, %c0_86] : memref<2x3x256xf32, #tpu.memory_space<vmem>>, vector<1x3x256xf32>
    %391 = vector.shape_cast %390 : vector<1x3x256xf32> to vector<3x256xf32>
    %392 = vector.shape_cast %389 : vector<3x256xf32> to vector<1x3x256xf32>
    tpu.vector_store %arg4[%c0_84, %c0_85, %c0_86], %392 {strides = array<i32>} : memref<2x3x256xf32, #tpu.memory_space<vmem>>, vector<1x3x256xf32>,
    %393 = vector.extract_strided_slice %388 {offsets = [0, 256], sizes = [3, 256], strides = [1, 1]} : vector<3x512xf32> to vector<3x256xf32>
    %c1 = arith.constant 1 : index
    %c0_87 = arith.constant 0 : index
    %c0_88 = arith.constant 0 : index
    %394 = vector.load %arg4[%c1, %c0_87, %c0_88] : memref<2x3x256xf32, #tpu.memory_space<vmem>>, vector<1x3x256xf32>
    %395 = vector.shape_cast %394 : vector<1x3x256xf32> to vector<3x256xf32>
    %396 = vector.shape_cast %393 : vector<3x256xf32> to vector<1x3x256xf32>
    tpu.vector_store %arg4[%c1, %c0_87, %c0_88], %396 {strides = array<i32>} : memref<2x3x256xf32, #tpu.memory_space<vmem>>, vector<1x3x256xf32>,
    return
  }
  func.func @transform_0(%arg0: i32) -> (i32, i32) {
    %c0_i32 = arith.constant 0 : i32
    %c0_i32_0 = arith.constant 0 : i32
    %c0_i32_1 = arith.constant 0 : i32
    return %c0_i32, %c0_i32_0 : i32, i32
  }
  func.func @transform_1(%arg0: i32) -> (i32, i32) {
    %c0_i32 = arith.constant 0 : i32
    %c0_i32_0 = arith.constant 0 : i32
    %c0_i32_1 = arith.constant 0 : i32
    return %c0_i32, %c0_i32_0 : i32, i32
  }
  func.func @transform_2(%arg0: i32) -> (i32, i32) {
    %c0_i32 = arith.constant 0 : i32
    %c0_i32_0 = arith.constant 0 : i32
    %c0_i32_1 = arith.constant 0 : i32
    return %c0_i32, %c0_i32_0 : i32, i32
  }
  func.func @transform_3(%arg0: i32) -> (i32, i32, i32) {
    %c0_i32 = arith.constant 0 : i32
    %c0_i32_0 = arith.constant 0 : i32
    %c0_i32_1 = arith.constant 0 : i32
    %c0_i32_2 = arith.constant 0 : i32
    return %c0_i32, %c0_i32_0, %c0_i32_1 : i32, i32, i32
  }
}

</mosaic_0001>

<bundles_post_ra>
// kernel: nvae_dec_forward.1
= control target key start
LH: loop header
LB: loop body
LE: loop exit
PB: predicated region body
PF: predicated region fallthrough
CT: control target
= control target key end

     0   :  { %8 = vsyncpa [#allocation3], 0  ;;  %s3248_s0 = inlined_call_operand.vmem [shape: f32[4,32], index: 0, kind: input, shape index: {}]   ;;  %s3249_s1 = inlined_call_operand.hbm [shape: f32[104,128], index: 1, kind: input, shape index: {}]   ;;  %s3250_s2 = inlined_call_operand.hbm [shape: f32[128,512], index: 2, kind: input, shape index: {}]   ;;  %s3251_s3 = inlined_call_operand.vmem [shape: f32[2,3,256], index: 3, kind: output, shape index: {}]  }
   0x1   :  { %9 = vsyncpa [#allocation5], 0  ;;  %s2422_s12 = smov [#allocation2]  }
   0x2   :  { %s17_s13 = sshll.u32 %s2422_s12, 4  ;;  %s18_s13 = int_to_ptr.vmem [resolvable:$true] %s17_s13 }
   0x3   :  { %s2386_s14 = scalar_lea.vmem %s18_s13, 1664  ;;  %p2391_p1 = scmp.lt.s32.totalorder %s18_s13, %s18_s13 }
   0x4   :  { %p2387_p0 = scmp.ne.s32.totalorder %s18_s13, %s2386_s14  ;;  %p2392_p2 = scmp.lt.s32.totalorder %s2386_s14, %s2386_s14 }
   0x6   :  { %p2393_p3 = por %p2392_p2, %p2391_p1 }
   0x8   :  { %p2394_p4 = pnand %p2393_p3, %p2387_p0 }
   0xa   :  { %2397 = shalt.err (!%p2394_p4)
}
   0xb   :  { %s2423_s15 = smov 128   ;;  %s2424_s16 = smov 8  }
   0xc   :  { %23 = dma.hbm_to_vmem [thread:$0]  %s3249_s1, 1664, %s18_s13, [#allocation3], %s2423_s15, %s2423_s15, %s2424_s16  }
   0xd   :  { %s2425_s19 = smov [#allocation4]  }
   0xe   :  { %s29_s20 = sshll.u32 %s2425_s19, 4  ;;  %s30_s20 = int_to_ptr.vmem [resolvable:$true] %s29_s20 }
   0xf   :  { %s2406_s21 = scalar_lea.vmem %s30_s20, 8192  ;;  %p2411_p6 = scmp.lt.s32.totalorder %s30_s20, %s30_s20 }
  0x10   :  { %p2407_p5 = scmp.ne.s32.totalorder %s30_s20, %s2406_s21  ;;  %p2412_p7 = scmp.lt.s32.totalorder %s2406_s21, %s2406_s21 }
  0x12   :  { %p2413_p8 = por %p2412_p7, %p2411_p6 }
  0x14   :  { %p2414_p9 = pnand %p2413_p8, %p2407_p5 }
  0x16   :  { %2417 = shalt.err (!%p2414_p9)
}
  0x17   :  { %s2426_s22 = smov 512   ;;  %s2427_s23 = smov 32  }
  0x18   :  { %35 = dma.hbm_to_vmem [thread:$0]  %s3250_s2, 8192, %s30_s20, [#allocation5], %s2426_s22, %s2426_s22, %s2427_s23  }
  0x19   :  { %2418 = dma.done.wait [#allocation3], 1664  }
  0x1a   :  { %2419 = vsyncadd [#allocation3], 4294965632 }
  0x1b   :  { %2420 = dma.done.wait [#allocation5], 8192  }
  0x1c   :  { %2421 = vsyncadd [#allocation5], 4294959104  ;;  %v2428_v0 = vmov 0.0   ;;  %vm2429_vm0 = vmmov 0   ;;  %v2430_v1 = vmov 12   ;;  %vm167_vm1 = vcmask 64512  }
  0x1d   :  { %2044 = vmatprep.subr.mxu1 %v2428_v0  ;;  %2046 = vmatprep.mubr.msk.f32.mxu1 %vm2429_vm0, %v2428_v0  ;;  %vm3260_vm2 = vcmask 1043456   ;;  %v86_v2 = vld [vmem:[#allocation2 + $0x8] sm:$0xff]  ;;  %v85_v3 = vld [vmem:[#allocation2] sm:$0xff]  ;;  %s2431_s26 = smov 120   ;;  %vm90_vm3 = vcmask 31744   ;;  %s2433_s27 = smov 123   ;;  %v43_v20 = vlaneseq }
  0x1e   :  { %2039 = vmatprep.subr.mxu0 %v2428_v0  ;;  %2041 = vmatprep.mubr.msk.f32.mxu0 %vm2429_vm0, %v2428_v0  ;;  %v84_v4 = vld [vmem:[%s3248_s0] sm:$0xf]  ;;  %s2432_s0 = smov 29   ;;  %s2434_s28 = smov 28   ;;  %v2446_v18 = vmov 72   ;;  %v2535_v19 = vld [vmem:[#allocation2 + $0x10] sm:$0xff] }
  0x1f   :  { %2157 = vset.pattern.permute.xlu0 %v2430_v1  ;;  %2045 = vmatpush3.msra.mxu1 %v85_v3  ;;  %s2435_s29 = smov 27   ;;  %s2436_s30 = smov 31   ;;  %v2538_v21 = vand.u32 127, %v43_v20  ;;  %vm325_vm6 = vcmask 220160   ;;  %vm306_vm9 = vcmask 236544   ;;  %vm316_vm10 = vcmask 228352  }
  0x20   :  { %88 = vrot.lane.b32.xlu0 %v86_v2, %s2431_s26  ;;  %2047 = vmatmul.mubr.msk.f32.vlgmr.msra.gmra.mxu1 %vm167_vm1, %v86_v2  ;;  %s2437_s4 = smov 125   ;;  %s2438_s5 = smov 3   ;;  %vm297_vm13 = vcmask 252928   ;;  %vm3269_vm14 = vmmov 1   ;;  %v329_v57 = vpack.c.bf16 %v2535_v19, %v2535_v19  ;;  %v391_v58 = vld [vmem:[#allocation2 + $0x60] sm:$0xff]  ;;  %v390_v59 = vld [vmem:[#allocation2 + $0x58] sm:$0xff] }
  0x21   :  { %2040 = vmatpush3.msk.msra.mxu0 %vm3260_vm2, %v84_v4  ;;  %2074 = vmatprep.subr.bf16.mxu1 %v2428_v0  ;;  %s2439_s6 = smov 124   ;;  %s2440_s7 = smov 1   ;;  %v45_v22 = vand.u32 15, %v2538_v21  ;;  %v389_v60 = vld [vmem:[#allocation2 + $0x50] sm:$0xff]  ;;  %v388_v61 = vld [vmem:[#allocation2 + $0x48] sm:$0xff]  ;;  %v971_v32 = vld [vmem:[#allocation4 + $0x1f0] sm:$0xff] }
  0x22   :  { %2049 = vmatprep.subr.bf16.mxu0 %v2428_v0  ;;  %2084 = vmatprep.mubr.msk.bf16.mxu1 %vm2429_vm0, %v2428_v0  ;;  %s2441_s8 = smov 127   ;;  %s2442_s9 = smov 5  }
  0x23   :  { %s2443_s10 = smov 99   ;;  %s2444_s11 = smov 4   ;;  %2158 = vset.pattern.permute.xlu1 %v2446_v18  ;;  %v46_v23 = vand.u32 3, %v45_v22  ;;  %vm48_vm4 = vcmp.lt.s32.totalorder %v45_v22, 12 }
  0x24   :  { %241 = vperm.xlu0 %2157, %v86_v2   ;;  %s2445_s12 = smov 97   ;;  %s2447_s13 = smov 101  }
  0x25   :  { %s2448_s14 = smov 100   ;;  %vm2541_vm5 = vcmp.lt.s32.totalorder %v46_v23, 3  ;;  %vm2548_vm8 = vcmp.gt.s32.totalorder %v46_v23, 0  ;;  %s2450_s15 = smov 121  }
  0x26   :  { %vm327_vm7 = vmand %vm48_vm4, %vm2541_vm5  ;;  %s2451_s17 = smov 119   ;;  %s2452_s18 = smov 7  }
  0x27   :  { %vm308_vm11 = vmand %vm48_vm4, %vm2548_vm8  ;;  %s2453_s19 = smov 9   ;;  %s2456_s20 = smov 111  }
  0x28   :  { %2159 = vset.pattern.permute.xlu0 %v2446_v18  ;;  %vm1838_vm12 = vmpackc.low %vm48_vm4, %vm308_vm11  ;;  %vm278_vm4 = vcmask 23552   ;;  %vm260_vm11 = vcmask 39936   ;;  %s2457_s21 = smov 112   ;;  %s2458_s22 = smov 15  }
  0x29   :  { %vm1841_vm15 = vmpackc.low %vm2541_vm5, %vm3269_vm14  ;;  %s2459_s23 = smov 17   ;;  %s2460_s24 = smov 16  }
  0x92   :  { %v89_v5 = vpop.permute.xlu0 %88 }
  0x93   :  { %2042 = vmatmul.mubr.msk.f32.vlgmr.msra.gmra.mxu0 %vm90_vm3, %v89_v5 }
  0x94   :  { %2059 = vmatprep.mubr.msk.bf16.mxu0 %vm2429_vm0, %v2428_v0 }
  0x9f   :  { %v242_v9 = vpop.permute.xlu0 %241 }
  0xe0   :  { %v236_v6 = vpop.f32.mrf.mxu1 }
  0xe2   :  { %v2048_v7 = vpop.f32.mrf.mxu1 }
 0x153   :  { %v163_v8 = vpop.f32.mrf.mxu0 }
 0x154   :  { %v237_v10 = vadd.f32 %v236_v6, %v163_v8 }
 0x155   :  { %v2043_v11 = vpop.f32.mrf.mxu0 }
 0x156   :  { %v2509_v12 = vadd.f32 %v242_v9, %v237_v10 }
 0x158   :  { %v1837_v13 = vmul.f32 -1.442695, %v2509_v12 }
 0x15a   :  { %2324 = vpow2.f32 %v1837_v13 }
 0x167   :  { %v2325_v14 = vpop.eup %2324 }
 0x168   :  { %v249_v15 = vadd.f32 1.0, %v2325_v14 }
 0x16a   :  { %2326 = vrcp.f32 %v249_v15  ;;  %v51_v15 = vand.u32 63, %v2538_v21 }
 0x177   :  { %v2327_v16 = vpop.eup %2326 }
 0x178   :  { %v2513_v17 = vmul.f32 %v2327_v16, %v2509_v12  ;;  %v52_v16 = vand.u32 7, %v51_v15 }
 0x17a   :  { %303 = vrot.lane.b32.xlu0 %v2513_v17, %s2432_s0  ;;  %319 = vrot.lane.b32.xlu1 %v2513_v17, %s2433_s27 }
 0x17e   :  { %313 = vrot.lane.b32.xlu0 %v2513_v17, %s2434_s28  ;;  %322 = vrot.lane.b32.xlu1 %v2513_v17, %s2435_s29 }
 0x182   :  { %294 = vrot.lane.b32.xlu0 %v2513_v17, %s2436_s30  ;;  %300 = vrot.lane.b32.xlu1 %v2513_v17, %s2437_s4 }
 0x186   :  { %275 = vrot.lane.b32.xlu0 %v2513_v17, %s2438_s5  ;;  %310 = vrot.lane.b32.xlu1 %v2513_v17, %s2439_s6 }
 0x18a   :  { %285 = vrot.lane.b32.xlu0 %v2513_v17, %s2440_s7  ;;  %291 = vrot.lane.b32.xlu1 %v2513_v17, %s2441_s8 }
 0x18e   :  { %257 = vrot.lane.b32.xlu0 %v2513_v17, %s2442_s9  ;;  %272 = vrot.lane.b32.xlu1 %v2513_v17, %s2443_s10 }
 0x192   :  { %267 = vrot.lane.b32.xlu0 %v2513_v17, %s2444_s11  ;;  %282 = vrot.lane.b32.xlu1 %v2513_v17, %s2445_s12 }
 0x196   :  { %254 = vrot.lane.b32.xlu1 %v2513_v17, %s2447_s13 }
 0x19a   :  { %264 = vrot.lane.b32.xlu1 %v2513_v17, %s2448_s14 }
 0x19e   :  { %337 = vperm.xlu1 %2158, %v2535_v19  }
 0x1ec   :  { %v304_v24 = vpop.permute.xlu0 %303  ;;  %v320_v25 = vpop.permute.xlu1 %319 }
 0x1f0   :  { %v314_v27 = vpop.permute.xlu0 %313  ;;  %v323_v28 = vpop.permute.xlu1 %322 }
 0x1f1   :  { %v326_v29 = vsel %vm325_vm6, %v320_v25, %v323_v28  ;;  %vm47_vm6 = vcmp.ge.s32.totalorder %v45_v22, 4  ;;  %v967_v22 = vld [vmem:[#allocation4 + $0x1d0] sm:$0xff] }
 0x1f2   :  { %v328_v30 = vsel %vm327_vm7, %v326_v29, 0.0  ;;  %vm3254_vm7 = vcmask 7168  }
 0x1f3   :  { %v334_v31 = vpack.c.bf16 %v328_v30, %v328_v30 }
 0x1f4   :  { %v295_v33 = vpop.permute.xlu0 %294  ;;  %v301_v34 = vpop.permute.xlu1 %300 }
 0x1f5   :  { %v345_v35 = vsel %vm3260_vm2, %v334_v31, 0  ;;  %v307_v37 = vsel %vm306_vm9, %v301_v34, %v304_v24  ;;  %vm280_vm9 = vmand %vm47_vm6, %vm2541_vm5 }
 0x1f6   :  { %2050 = vmatpush3.bf16.msra.mxu0 %v345_v35 }
 0x1f7   :  { %2051 = vmatprep.subr.bf16.mxu0 %v2428_v0 }
 0x1f8   :  { %v311_v36 = vpop.permute.xlu1 %310  ;;  %v276_v39 = vpop.permute.xlu0 %275 }
 0x1f9   :  { %v317_v38 = vsel %vm316_vm10, %v311_v36, %v314_v27  ;;  %vm1844_vm10 = vmpackc.low %vm2548_vm8, %vm280_vm9  ;;  %vm2613_vm9 = vcmp.gt.s32.totalorder %v52_v16, 0 }
 0x1fa   :  { %v1839_v40 = vpack.c.bf16 %v317_v38, %v307_v37  ;;  %v955_v38 = vld [vmem:[#allocation4 + $0x170] sm:$0xff] }
 0x1fc   :  { %2052 = vmatpush3.bf16.msk.msra.mxu0 %vm1838_vm12, %v1839_v40  ;;  %v292_v41 = vpop.permute.xlu1 %291  ;;  %v286_v44 = vpop.permute.xlu0 %285  ;;  %vm262_vm12 = vmand %vm47_vm6, %vm2548_vm8  ;;  %vm392_vm8 = vcmask 261120  }
 0x1fd   :  { %v298_v42 = vsel %vm297_vm13, %v292_v41, %v295_v33  ;;  %2053 = vmatprep.subr.bf16.mxu0 %v2428_v0  ;;  %vm1847_vm5 = vmpackc.low %vm47_vm6, %vm262_vm12  ;;  %vm3253_vm13 = vcmask 588800   ;;  %vm2603_vm6 = vcmp.lt.s32.totalorder %v52_v16, 7  ;;  %vm53_vm12 = vcmp.ge.s32.totalorder %v51_v15, 8  ;;  %v654_v41 = vld [vmem:[#allocation2 + $0x28] sm:$0xff]  ;;  %v964_v33 = vld [vmem:[#allocation4 + $0x1b8] sm:$0xff] }
 0x1fe   :  { %v1842_v43 = vpack.c.bf16 %v298_v42, %v2513_v17  ;;  %v570_v42 = vld [vmem:[#allocation2 + $0x20] sm:$0xff]  ;;  %v961_v16 = vld [vmem:[#allocation4 + $0x1a0] sm:$0xff]  ;;  %v958_v17 = vld [vmem:[#allocation4 + $0x188] sm:$0xff] }
 0x200   :  { %2054 = vmatpush3.bf16.msk.msra.mxu0 %vm1841_vm15, %v1842_v43  ;;  %v273_v45 = vpop.permute.xlu1 %272  ;;  %v258_v49 = vpop.permute.xlu0 %257  ;;  %vm54_vm15 = vcmp.lt.s32.totalorder %v51_v15, 56  ;;  %v2454_v43 = vmov 8   ;;  %v962_v15 = vld [vmem:[#allocation4 + $0x1a8] sm:$0xff] }
 0x201   :  { %2055 = vmatprep.subr.bf16.mxu0 %v2428_v0  ;;  %v279_v47 = vsel %vm278_vm4, %v273_v45, %v276_v39  ;;  %vm2609_vm4 = vmand %vm54_vm15, %vm2603_vm6  ;;  %2160 = vset.pattern.permute.xlu1 %v2454_v43  ;;  %v921_v43 = vld [vmem:[#allocation4 + $0x60] sm:$0xff] }
 0x204   :  { %v283_v46 = vpop.permute.xlu1 %282  ;;  %v268_v52 = vpop.permute.xlu0 %267 }
 0x205   :  { %v289_v48 = vsel %vm3254_vm7, %v283_v46, %v286_v44 }
 0x206   :  { %v1845_v50 = vpack.c.bf16 %v289_v48, %v279_v47 }
 0x208   :  { %2056 = vmatpush3.bf16.msk.msra.mxu0 %vm1844_vm10, %v1845_v50  ;;  %v255_v51 = vpop.permute.xlu1 %254  ;;  %vm501_vm10 = vmand %vm54_vm15, %vm2613_vm9 }
 0x209   :  { %2057 = vmatprep.subr.bf16.mxu0 %v2428_v0  ;;  %v261_v54 = vsel %vm260_vm11, %v255_v51, %v258_v49  ;;  %vm2623_vm11 = vmpackc.low %vm54_vm15, %vm501_vm10 }
 0x20a   :  { %vm478_vm10 = vmand %vm53_vm12, %vm2613_vm9 }
 0x20c   :  { %v265_v53 = vpop.permute.xlu1 %264 }
 0x20d   :  { %v270_v55 = vsel %vm90_vm3, %v265_v53, %v268_v52 }
 0x20e   :  { %v1848_v56 = vpack.c.bf16 %v270_v55, %v261_v54 }
 0x210   :  { %2058 = vmatpush3.bf16.msk.msra.mxu0 %vm1847_vm5, %v1848_v56  ;;  %vm2633_vm5 = vmpackc.low %vm2603_vm6, %vm3269_vm14 }
 0x211   :  { %2063 = vmatprep.subr.mxu0 %v2428_v0 }
 0x213   :  { %2060 = vmatmul.mubr.msk.bf16.vlgmr.msra.gmra.mxu0 %vm3253_vm13, %v329_v57 }
 0x214   :  { %2064 = vmatpush3.msra.mxu0 %v391_v58  ;;  %2071 = vmatprep.mubr.msk.f32.mxu0 %vm2429_vm0, %v2428_v0 }
 0x215   :  { %2065 = vmatprep.subr.mxu0 %v2428_v0 }
 0x216   :  { %2066 = vmatpush3.msra.mxu0 %v390_v59 }
 0x217   :  { %2067 = vmatprep.subr.mxu0 %v2428_v0 }
 0x218   :  { %2068 = vmatpush3.msra.mxu0 %v389_v60 }
 0x219   :  { %2069 = vmatprep.subr.mxu0 %v2428_v0  ;;  %v338_v62 = vpop.permute.xlu1 %337 }
 0x21a   :  { %2070 = vmatpush3.msra.mxu0 %v388_v61 }
 0x21b   :  { %2088 = vmatprep.subr.mxu0 %v2428_v0 }
 0x2d3   :  { %v381_v63 = vpop.f32.mrf.mxu0 }
 0x2d4   :  { %v382_v2 = vadd.f32 %v381_v63, %v338_v62 }
 0x2d5   :  { %v2061_v3 = vpop.f32.mrf.mxu0 }
 0x2d6   :  { %v387_v4 = vadd.f32 %v382_v2, %v2509_v12  ;;  %v466_v12 = vld [vmem:[#allocation2 + $0x18] sm:$0xff] }
 0x2d7   :  { %v384_v5 = vpop.f32.mrf.mxu0  ;;  %v512_v40 = vpack.c.bf16 %v466_v12, %v466_v12 }
 0x2d8   :  { %2072 = vmatmul.mubr.msk.f32.vlgmr.msra.gmra.mxu0 %vm392_vm8, %v387_v4  ;;  %vm2640_vm8 = vmand %vm53_vm12, %vm2603_vm6 }
 0x2d9   :  { %v2062_v6 = vpop.f32.mrf.mxu0  ;;  %2090 = vmatprep.mubr.msk.f32.mxu0 %vm2429_vm0, %v2428_v0  ;;  %vm1859_vm15 = vmpackc.low %vm2613_vm9, %vm2640_vm8 }
 0x2da   :  { %vm2661_vm6 = vmpackc.low %vm53_vm12, %vm478_vm10 }
 0x398   :  { %v2589_v7 = vpop.f32.mrf.mxu0 }
 0x399   :  { %v1852_v8 = vmul.f32 -1.442695, %v2589_v7 }
 0x39a   :  { %v2073_v9 = vpop.f32.mrf.mxu0 }
 0x39b   :  { %2328 = vpow2.f32 %v1852_v8 }
 0x3a8   :  { %v2329_v10 = vpop.eup %2328 }
 0x3a9   :  { %v470_v11 = vadd.f32 1.0, %v2329_v10  ;;  %v970_v10 = vld [vmem:[#allocation4 + $0x1e8] sm:$0xff] }
 0x3ab   :  { %2330 = vrcp.f32 %v470_v11  ;;  %v969_v11 = vld [vmem:[#allocation4 + $0x1e0] sm:$0xff] }
 0x3b8   :  { %v2331_v13 = vpop.eup %2330 }
 0x3b9   :  { %v473_v14 = vmul.f32 %v2331_v13, %v2589_v7  ;;  %v2704_v13 = vld [vmem:[#allocation2 + $0x30] sm:$0xff] }
 0x3bb   :  { %498 = vrot.lane.b32.xlu1 %v473_v14, %s2450_s15  ;;  %507 = vrot.lane.b32.xlu0 %v473_v14, %s2451_s17 }
 0x3bf   :  { %493 = vrot.lane.b32.xlu1 %v473_v14, %s2441_s8  ;;  %503 = vrot.lane.b32.xlu0 %v473_v14, %s2431_s26 }
 0x3c3   :  { %489 = vrot.lane.b32.xlu1 %v473_v14, %s2440_s7  ;;  %484 = vrot.lane.b32.xlu0 %v473_v14, %s2452_s18 }
 0x3c7   :  { %480 = vrot.lane.b32.xlu1 %v473_v14, %s2424_s16  ;;  %475 = vrot.lane.b32.xlu0 %v473_v14, %s2453_s19 }
 0x3cb   :  { %520 = vperm.xlu0 %2159, %v466_v12   ;;  %579 = vperm.xlu1 %2160, %v570_v42   ;;  %v965_v12 = vld [vmem:[#allocation4 + $0x1c0] sm:$0xff] }
 0x3cf   :  { %2161 = vset.pattern.permute.xlu0 %v2430_v1  ;;  %656 = vrot.lane.b32.xlu1 %v654_v41, %s2431_s26 }
 0x3d0   :  { %806 = vperm.xlu0 %2161, %v654_v41   ;;  %2323 = vset.pattern.permute.xlu1 %v2446_v18 }
 0x3d4   :  { %2162 = vset.pattern.permute.xlu0 %v2446_v18 }
 0x42d   :  { %v499_v20 = vpop.permute.xlu1 %498  ;;  %v508_v1 = vpop.permute.xlu0 %507 }
 0x42e   :  { %v511_v23 = vsel %vm2609_vm4, %v508_v1, 0.0  ;;  %v954_v1 = vld [vmem:[#allocation4 + $0x168] sm:$0xff] }
 0x42f   :  { %v517_v24 = vpack.c.bf16 %v511_v23, %v511_v23  ;;  %v953_v23 = vld [vmem:[#allocation4 + $0x160] sm:$0xff] }
 0x431   :  { %v527_v25 = vsel %vm3260_vm2, %v517_v24, 0  ;;  %v494_v26 = vpop.permute.xlu1 %493  ;;  %v504_v27 = vpop.permute.xlu0 %503  ;;  %v950_v24 = vld [vmem:[#allocation4 + $0x148] sm:$0xff] }
 0x432   :  { %2075 = vmatpush3.bf16.msra.mxu1 %v527_v25  ;;  %v1854_v29 = vpack.c.bf16 %v504_v27, %v499_v20  ;;  %v1857_v34 = vpack.c.bf16 %v494_v26, %v473_v14  ;;  %v966_v14 = vld [vmem:[#allocation4 + $0x1c8] sm:$0xff]  ;;  %v957_v20 = vld [vmem:[#allocation4 + $0x180] sm:$0xff] }
 0x433   :  { %2076 = vmatprep.subr.bf16.mxu1 %v2428_v0  ;;  %v949_v25 = vld [vmem:[#allocation4 + $0x140] sm:$0xff]  ;;  %v946_v26 = vld [vmem:[#allocation4 + $0x128] sm:$0xff] }
 0x434   :  { %v945_v27 = vld [vmem:[#allocation4 + $0x120] sm:$0xff] }
 0x435   :  { %v490_v30 = vpop.permute.xlu1 %489  ;;  %v485_v31 = vpop.permute.xlu0 %484 }
 0x436   :  { %2077 = vmatpush3.bf16.msk.msra.mxu1 %vm2623_vm11, %v1854_v29  ;;  %v1860_v35 = vpack.c.bf16 %v490_v30, %v485_v31  ;;  %v942_v29 = vld [vmem:[#allocation4 + $0x108] sm:$0xff]  ;;  %v941_v30 = vld [vmem:[#allocation4 + $0x100] sm:$0xff] }
 0x437   :  { %2078 = vmatprep.subr.bf16.mxu1 %v2428_v0  ;;  %v938_v31 = vld [vmem:[#allocation4 + $0xe8] sm:$0xff] }
 0x439   :  { %v481_v36 = vpop.permute.xlu1 %480  ;;  %v476_v37 = vpop.permute.xlu0 %475 }
 0x43a   :  { %2079 = vmatpush3.bf16.msk.msra.mxu1 %vm2633_vm5, %v1857_v34  ;;  %v1863_v39 = vpack.c.bf16 %v481_v36, %v476_v37  ;;  %v937_v34 = vld [vmem:[#allocation4 + $0xe0] sm:$0xff]  ;;  %v930_v37 = vld [vmem:[#allocation4 + $0xa8] sm:$0xff] }
 0x43b   :  { %2080 = vmatprep.subr.bf16.mxu1 %v2428_v0  ;;  %v933_v36 = vld [vmem:[#allocation4 + $0xc0] sm:$0xff] }
 0x43e   :  { %2081 = vmatpush3.bf16.msk.msra.mxu1 %vm1859_vm15, %v1860_v35  ;;  %v934_v35 = vld [vmem:[#allocation4 + $0xc8] sm:$0xff] }
 0x43f   :  { %2082 = vmatprep.subr.bf16.mxu1 %v2428_v0 }
 0x442   :  { %2083 = vmatpush3.bf16.msk.msra.mxu1 %vm2661_vm6, %v1863_v39  ;;  %v929_v39 = vld [vmem:[#allocation4 + $0xa0] sm:$0xff] }
 0x443   :  { %2103 = vmatprep.subr.bf16.mxu1 %v2428_v0 }
 0x445   :  { %2085 = vmatmul.mubr.msk.bf16.vlgmr.msra.gmra.mxu1 %vm3253_vm13, %v512_v40  ;;  %v926_v40 = vld [vmem:[#allocation4 + $0x88] sm:$0xff] }
 0x446   :  { %2113 = vmatprep.mubr.msk.bf16.mxu1 %vm2429_vm0, %v2428_v0  ;;  %v521_v44 = vpop.permute.xlu0 %520  ;;  %v580_v18 = vpop.permute.xlu1 %579 }
 0x44a   :  { %v657_v58 = vpop.permute.xlu1 %656 }
 0x44b   :  { %v807_v63 = vpop.permute.xlu0 %806 }
 0x505   :  { %v563_v45 = vpop.f32.mrf.mxu1 }
 0x506   :  { %v564_v46 = vadd.f32 %v563_v45, %v521_v44  ;;  %v918_v44 = vld [vmem:[#allocation4 + $0x48] sm:$0xff]  ;;  %v917_v45 = vld [vmem:[#allocation4 + $0x40] sm:$0xff] }
 0x507   :  { %v2086_v47 = vpop.f32.mrf.mxu1 }
 0x508   :  { %v569_v48 = vadd.f32 %v564_v46, %v2589_v7 }
 0x509   :  { %v566_v49 = vpop.f32.mrf.mxu1 }
 0x50a   :  { %v572_v50 = vmin.f32 %v569_v48, 0.0  ;;  %vm571_vm12 = vcmp.gt.f32.partialorder %v569_v48, 0.0 }
 0x50b   :  { %v2087_v51 = vpop.f32.mrf.mxu1 }
 0x50c   :  { %v573_v52 = vmul.f32 1.442695, %v572_v50 }
 0x50e   :  { %2332 = vpow2.f32 %v573_v52 }
 0x51b   :  { %v2333_v53 = vpop.eup %2332 }
 0x51c   :  { %v1866_v54 = vadd.f32 -1.0, %v2333_v53 }
 0x51e   :  { %v576_v55 = vsel %vm571_vm12, %v569_v48, %v1866_v54 }
 0x51f   :  { %2089 = vmatpush3.msra.mxu0 %v576_v55 }
 0x520   :  { %2091 = vmatmul.mubr.msk.f32.vlgmr.msra.gmra.mxu0 %vm167_vm1, %v570_v42  ;;  %2093 = vmatprep.subr.mxu0 %v2428_v0  ;;  %v922_v42 = vld [vmem:[#allocation4 + $0x68] sm:$0xff] }
 0x521   :  { %2095 = vmatprep.mubr.msk.f32.mxu0 %vm2429_vm0, %v2428_v0 }
 0x5e0   :  { %v650_v56 = vpop.f32.mrf.mxu0 }
 0x5e1   :  { %v651_v57 = vadd.f32 %v650_v56, %v580_v18 }
 0x5e2   :  { %v2092_v59 = vpop.f32.mrf.mxu0 }
 0x5e3   :  { %2094 = vmatpush3.msk.msra.mxu0 %vm3260_vm2, %v651_v57  ;;  %v851_v59 = vpack.c.bf16 %v2704_v13, %v2704_v13 }
 0x5e4   :  { %2096 = vmatmul.mubr.msk.f32.vlgmr.msra.gmra.mxu0 %vm90_vm3, %v657_v58  ;;  %2098 = vmatprep.subr.mxu0 %v2428_v0  ;;  %v972_v58 = vld [vmem:[#allocation4 + $0x1f8] sm:$0xff] }
 0x5e5   :  { %2099 = vmatpush3.msra.mxu0 %v569_v48  ;;  %2100 = vmatprep.mubr.msk.f32.mxu0 %vm2429_vm0, %v2428_v0  ;;  %vm3252_vm0 = vcmask 908288  }
 0x5e6   :  { %973 = vmatprep.subr.mxu0 %v970_v10  ;;  %v939_v10 = vld [vmem:[#allocation4 + $0xf0] sm:$0xff] }
 0x5e8   :  { %2101 = vmatmul.mubr.msk.f32.vlgmr.msra.gmra.mxu0 %vm167_vm1, %v654_v41  ;;  %v925_v41 = vld [vmem:[#allocation4 + $0x80] sm:$0xff] }
 0x5e9   :  { %1037 = vmatprep.mubr.f32.mxu0 %v2428_v0  ;;  %974 = vmatpush1.msra.mxu0 %v969_v11  ;;  %v936_v11 = vld [vmem:[#allocation4 + $0xd8] sm:$0xff] }
 0x5ea   :  { %975 = vmatprep.subr.mxu0 %v966_v14  ;;  %v932_v14 = vld [vmem:[#allocation4 + $0xb8] sm:$0xff] }
 0x5eb   :  { %976 = vmatpush1.msra.mxu0 %v965_v12  ;;  %v931_v12 = vld [vmem:[#allocation4 + $0xb0] sm:$0xff] }
 0x5ec   :  { %977 = vmatprep.subr.mxu0 %v962_v15  ;;  %v928_v15 = vld [vmem:[#allocation4 + $0x98] sm:$0xff] }
 0x5ed   :  { %978 = vmatpush1.msra.mxu0 %v961_v16  ;;  %v927_v16 = vld [vmem:[#allocation4 + $0x90] sm:$0xff] }
 0x5ee   :  { %979 = vmatprep.subr.mxu0 %v958_v17  ;;  %v924_v17 = vld [vmem:[#allocation4 + $0x78] sm:$0xff] }
 0x5ef   :  { %980 = vmatpush1.msra.mxu0 %v957_v20  ;;  %v923_v20 = vld [vmem:[#allocation4 + $0x70] sm:$0xff] }
 0x5f0   :  { %981 = vmatprep.subr.mxu0 %v954_v1  ;;  %v920_v1 = vld [vmem:[#allocation4 + $0x58] sm:$0xff] }
 0x5f1   :  { %982 = vmatpush1.msra.mxu0 %v953_v23  ;;  %v919_v23 = vld [vmem:[#allocation4 + $0x50] sm:$0xff] }
 0x5f2   :  { %983 = vmatprep.subr.mxu0 %v950_v24  ;;  %v914_v24 = vld [vmem:[#allocation4 + $0x28] sm:$0xff] }
 0x5f3   :  { %984 = vmatpush1.msra.mxu0 %v949_v25  ;;  %v916_v25 = vld [vmem:[#allocation4 + $0x38] sm:$0xff] }
 0x5f4   :  { %985 = vmatprep.subr.mxu0 %v946_v26  ;;  %v913_v26 = vld [vmem:[#allocation4 + $0x20] sm:$0xff] }
 0x5f5   :  { %986 = vmatpush1.msra.mxu0 %v945_v27  ;;  %v915_v27 = vld [vmem:[#allocation4 + $0x30] sm:$0xff] }
 0x5f6   :  { %987 = vmatprep.subr.mxu0 %v942_v29  ;;  %v910_v29 = vld [vmem:[#allocation4 + $0x8] sm:$0xff] }
 0x5f7   :  { %988 = vmatpush1.msra.mxu0 %v941_v30  ;;  %v912_v30 = vld [vmem:[#allocation4 + $0x18] sm:$0xff] }
 0x5f8   :  { %989 = vmatprep.subr.mxu0 %v938_v31  ;;  %v909_v31 = vld [vmem:[#allocation4] sm:$0xff] }
 0x5f9   :  { %990 = vmatpush1.msra.mxu0 %v937_v34  ;;  %v911_v34 = vld [vmem:[#allocation4 + $0x10] sm:$0xff] }
 0x5fa   :  { %991 = vmatprep.subr.mxu0 %v934_v35 }
 0x5fb   :  { %992 = vmatpush1.msra.mxu0 %v933_v36 }
 0x5fc   :  { %993 = vmatprep.subr.mxu0 %v930_v37 }
 0x5fd   :  { %994 = vmatpush1.msra.mxu0 %v929_v39 }
 0x5fe   :  { %995 = vmatprep.subr.mxu0 %v926_v40 }
 0x5ff   :  { %996 = vmatpush1.msra.mxu0 %v925_v41 }
 0x600   :  { %997 = vmatprep.subr.mxu0 %v922_v42 }
 0x601   :  { %998 = vmatpush1.msra.mxu0 %v921_v43 }
 0x602   :  { %999 = vmatprep.subr.mxu0 %v918_v44 }
 0x603   :  { %1000 = vmatpush1.msra.mxu0 %v917_v45 }
 0x604   :  { %1001 = vmatprep.subr.mxu0 %v914_v24 }
 0x605   :  { %1002 = vmatpush1.msra.mxu0 %v913_v26 }
 0x606   :  { %1003 = vmatprep.subr.mxu0 %v910_v29 }
 0x607   :  { %1004 = vmatpush1.msra.mxu0 %v909_v31 }
 0x6a4   :  { %v729_v60 = vpop.f32.mrf.mxu0 }
 0x6a6   :  { %v2097_v61 = vpop.f32.mrf.mxu0 }
 0x6a7   :  { %v963_v61 = vld [vmem:[#allocation4 + $0x1b0] sm:$0xff] }
 0x6a8   :  { %v801_v62 = vpop.f32.mrf.mxu0 }
 0x6a9   :  { %v802_v2 = vadd.f32 %v801_v62, %v729_v60  ;;  %v968_v60 = vld [vmem:[#allocation4 + $0x1d8] sm:$0xff] }
 0x6aa   :  { %v2102_v3 = vpop.f32.mrf.mxu0  ;;  %v960_v62 = vld [vmem:[#allocation4 + $0x198] sm:$0xff] }
 0x6ab   :  { %v2686_v4 = vadd.f32 %v807_v63, %v802_v2  ;;  %v959_v63 = vld [vmem:[#allocation4 + $0x190] sm:$0xff]  ;;  %v956_v2 = vld [vmem:[#allocation4 + $0x178] sm:$0xff] }
 0x6ac   :  { %v952_v3 = vld [vmem:[#allocation4 + $0x158] sm:$0xff] }
 0x6ad   :  { %v1871_v5 = vmul.f32 -1.442695, %v2686_v4 }
 0x6af   :  { %2334 = vpow2.f32 %v1871_v5  ;;  %v951_v5 = vld [vmem:[#allocation4 + $0x150] sm:$0xff] }
 0x6bc   :  { %v2335_v6 = vpop.eup %2334 }
 0x6bd   :  { %v814_v7 = vadd.f32 1.0, %v2335_v6  ;;  %v948_v6 = vld [vmem:[#allocation4 + $0x138] sm:$0xff] }
 0x6bf   :  { %2336 = vrcp.f32 %v814_v7  ;;  %v947_v7 = vld [vmem:[#allocation4 + $0x130] sm:$0xff] }
 0x6cc   :  { %v2337_v8 = vpop.eup %2336 }
 0x6cd   :  { %v2690_v9 = vmul.f32 %v2337_v8, %v2686_v4  ;;  %v943_v8 = vld [vmem:[#allocation4 + $0x110] sm:$0xff] }
 0x6cf   :  { %843 = vrot.lane.b32.xlu0 %v2690_v9, %s2431_s26  ;;  %847 = vrot.lane.b32.xlu1 %v2690_v9, %s2451_s17 }
 0x6d3   :  { %827 = vrot.lane.b32.xlu0 %v2690_v9, %s2452_s18  ;;  %839 = vrot.lane.b32.xlu1 %v2690_v9, %s2450_s15 }
 0x6d7   :  { %819 = vrot.lane.b32.xlu0 %v2690_v9, %s2453_s19  ;;  %835 = vrot.lane.b32.xlu1 %v2690_v9, %s2441_s8 }
 0x6db   :  { %831 = vrot.lane.b32.xlu1 %v2690_v9, %s2440_s7  ;;  %859 = vperm.xlu0 %2162, %v2704_v13   ;;  %v935_v13 = vld [vmem:[#allocation4 + $0xd0] sm:$0xff] }
 0x6df   :  { %823 = vrot.lane.b32.xlu1 %v2690_v9, %s2424_s16  ;;  %s2455_s16 = smov 113  }
 0x741   :  { %v848_v46 = vpop.permute.xlu1 %847  ;;  %v844_v51 = vpop.permute.xlu0 %843 }
 0x742   :  { %v850_v47 = vsel %vm2609_vm4, %v848_v46, 0.0 }
 0x743   :  { %v856_v48 = vpack.c.bf16 %v850_v47, %v850_v47 }
 0x745   :  { %v866_v49 = vsel %vm3260_vm2, %v856_v48, 0  ;;  %v840_v50 = vpop.permute.xlu1 %839  ;;  %v828_v55 = vpop.permute.xlu0 %827 }
 0x746   :  { %2104 = vmatpush3.bf16.msra.mxu1 %v866_v49  ;;  %v1873_v52 = vpack.c.bf16 %v844_v51, %v840_v50 }
 0x747   :  { %2105 = vmatprep.subr.bf16.mxu1 %v2428_v0 }
 0x749   :  { %v836_v53 = vpop.permute.xlu1 %835  ;;  %v820_v28 = vpop.permute.xlu0 %819 }
 0x74a   :  { %2106 = vmatpush3.bf16.msk.msra.mxu1 %vm2623_vm11, %v1873_v52  ;;  %v1876_v54 = vpack.c.bf16 %v836_v53, %v2690_v9  ;;  %v940_v9 = vld [vmem:[#allocation4 + $0xf8] sm:$0xff] }
 0x74b   :  { %2107 = vmatprep.subr.bf16.mxu1 %v2428_v0 }
 0x74d   :  { %v832_v19 = vpop.permute.xlu1 %831 }
 0x74e   :  { %2108 = vmatpush3.bf16.msk.msra.mxu1 %vm2633_vm5, %v1876_v54  ;;  %v1879_v18 = vpack.c.bf16 %v832_v19, %v828_v55 }
 0x74f   :  { %2109 = vmatprep.subr.bf16.mxu1 %v2428_v0 }
 0x751   :  { %v824_v56 = vpop.permute.xlu1 %823 }
 0x752   :  { %2110 = vmatpush3.bf16.msk.msra.mxu1 %vm1859_vm15, %v1879_v18  ;;  %v1882_v57 = vpack.c.bf16 %v824_v56, %v820_v28  ;;  %vm3261_vm15 = vcmask 916480  }
 0x753   :  { %2111 = vmatprep.subr.bf16.mxu1 %v2428_v0 }
 0x756   :  { %2112 = vmatpush3.bf16.msk.msra.mxu1 %vm2661_vm6, %v1882_v57  ;;  %v860_v35 = vpop.permute.xlu0 %859 }
 0x757   :  { %1044 = vmatprep.subr.mxu1 %v972_v58 }
 0x759   :  { %2114 = vmatmul.mubr.msk.bf16.vlgmr.msra.gmra.mxu1 %vm3253_vm13, %v851_v59  ;;  %vm3265_vm13 = vcmask 1039360  }
 0x75a   :  { %1045 = vmatpush1.msra.mxu1 %v971_v32  ;;  %1108 = vmatprep.mubr.f32.mxu1 %v2428_v0  ;;  %v944_v0 = vld [vmem:[#allocation4 + $0x118] sm:$0xff] }
 0x75b   :  { %1046 = vmatprep.subr.mxu1 %v968_v60 }
 0x75c   :  { %1047 = vmatpush1.msra.mxu1 %v967_v22 }
 0x75d   :  { %1048 = vmatprep.subr.mxu1 %v964_v33 }
 0x75e   :  { %1049 = vmatpush1.msra.mxu1 %v963_v61 }
 0x75f   :  { %1050 = vmatprep.subr.mxu1 %v960_v62 }
 0x760   :  { %1051 = vmatpush1.msra.mxu1 %v959_v63 }
 0x761   :  { %1052 = vmatprep.subr.mxu1 %v956_v2  ;;  %v2781_v2 = vld [vmem:[#allocation2 + $0x38] sm:$0xff] }
 0x762   :  { %1053 = vmatpush1.msra.mxu1 %v955_v38  ;;  %v2461_v38 = vmov 0  }
 0x763   :  { %1054 = vmatprep.subr.mxu1 %v952_v3  ;;  %v57_v3 = vadd.s32 128, %v2538_v21 }
 0x764   :  { %1055 = vmatpush1.msra.mxu1 %v951_v5  ;;  %v59_v5 = vadd.s32 384, %v2538_v21 }
 0x765   :  { %1056 = vmatprep.subr.mxu1 %v948_v6  ;;  %v61_v6 = vand.u32 255, %v57_v3 }
 0x766   :  { %1057 = vmatpush1.msra.mxu1 %v947_v7  ;;  %v63_v7 = vand.u32 255, %v59_v5 }
 0x767   :  { %1058 = vmatprep.subr.mxu1 %v944_v0  ;;  %v60_v0 = vand.u32 255, %v2538_v21  ;;  %vm2805_vm1 = vcmp.lt.s32.totalorder %v61_v6, 240 }
 0x768   :  { %1059 = vmatpush1.msra.mxu1 %v943_v8  ;;  %v2792_v8 = vadd.s32 256, %v2538_v21  ;;  %vm2810_vm4 = vcmp.lt.s32.totalorder %v63_v7, 240 }
 0x769   :  { %1060 = vmatprep.subr.mxu1 %v940_v9  ;;  %v2794_v9 = vand.u32 15, %v61_v6 }
 0x76a   :  { %1061 = vmatpush1.msra.mxu1 %v939_v10  ;;  %v2796_v10 = vand.u32 15, %v63_v7 }
 0x76b   :  { %1062 = vmatprep.subr.mxu1 %v936_v11  ;;  %v2800_v11 = vand.u32 15, %v60_v0  ;;  %vm3268_vm3 = vcmp.lt.s32.totalorder %v2794_v9, 15  ;;  %vm3257_vm6 = vcmp.gt.s32.totalorder %v2794_v9, 0 }
 0x76c   :  { %1063 = vmatpush1.msra.mxu1 %v935_v13  ;;  %v62_v13 = vand.u32 255, %v2792_v8  ;;  %vm3256_vm9 = vcmp.lt.s32.totalorder %v2796_v10, 15  ;;  %vm2825_vm5 = vmand %vm2805_vm1, %vm3268_vm3  ;;  %vm3258_vm12 = vcmp.gt.s32.totalorder %v2796_v10, 0 }
 0x76d   :  { %1064 = vmatprep.subr.mxu1 %v932_v14  ;;  %vm3255_vm11 = vcmp.lt.s32.totalorder %v2800_v11, 15  ;;  %vm2833_vm8 = vmand %vm2810_vm4, %vm3256_vm9 }
 0x76e   :  { %1065 = vmatpush1.msra.mxu1 %v931_v12  ;;  %vm2855_vm7 = vmand %vm2805_vm1, %vm3257_vm6 }
 0x76f   :  { %1066 = vmatprep.subr.mxu1 %v928_v15  ;;  %vm2872_vm6 = vmand %vm2810_vm4, %vm3258_vm12 }
 0x770   :  { %1067 = vmatpush1.msra.mxu1 %v927_v16  ;;  %vm3263_vm12 = vmpackc.low %vm2805_vm1, %vm2855_vm7 }
 0x771   :  { %1068 = vmatprep.subr.mxu1 %v924_v17  ;;  %v3309_v17 = vmov 0 }
 0x772   :  { %1069 = vmatpush1.msra.mxu1 %v923_v20  ;;  %v3310_v17 = vsel %vm2805_vm1, 4294967295, %v3309_v17  ;;  %v3311_v20 = vmov 0 }
 0x773   :  { %1070 = vmatprep.subr.mxu1 %v920_v1  ;;  %v3312_v20 = vsel %vm2810_vm4, 4294967295, %v3311_v20 }
 0x774   :  { %1071 = vmatpush1.msra.mxu1 %v919_v23  ;;  %v2819_v23 = vand.u32 15, %v62_v13 }
 0x775   :  { %1072 = vmatprep.subr.mxu1 %v916_v25 }
 0x776   :  { %1073 = vmatpush1.msra.mxu1 %v915_v27  ;;  %vm3259_vm10 = vcmp.lt.s32.totalorder %v2819_v23, 15  ;;  %vm3266_vm9 = vcmp.gt.s32.totalorder %v2819_v23, 0 }
 0x777   :  { %1074 = vmatprep.subr.mxu1 %v912_v30 }
 0x778   :  { %1075 = vmatpush1.msra.mxu1 %v911_v34 }
 0x819   :  { %v902_v36 = vpop.f32.mrf.mxu1 }
 0x81a   :  { %v903_v37 = vadd.f32 %v902_v36, %v860_v35 }
 0x81b   :  { %v2115_v39 = vpop.f32.mrf.mxu1 }
 0x81c   :  { %v908_v40 = vadd.f32 %v903_v37, %v2686_v4 }
 0x81d   :  { %v905_v41 = vpop.f32.mrf.mxu1 }
 0x81e   :  { %1038 = vmatmul.mubr.f32.vlgmr.msra.gmra.mxu0 %v908_v40  ;;  %1109 = vmatmul.mubr.f32.vlgmr.msra.gmra.mxu1 %v908_v40 }
 0x81f   :  { %v2116_v42 = vpop.f32.mrf.mxu1  ;;  %1411 = vmatprep.mubr.bf16.mxu0 %v2461_v38  ;;  %1452 = vmatprep.mubr.bf16.mxu1 %v2461_v38 }
 0x8de   :  { %v2735_v43 = vpop.f32.mrf.mxu0  ;;  %v2737_v44 = vpop.f32.mrf.mxu1 }
 0x8df   :  { %v1885_v45 = vmul.f32 -1.442695, %v2735_v43  ;;  %v1887_v46 = vmul.f32 -1.442695, %v2737_v44 }
 0x8e0   :  { %v2741_v47 = vpop.f32.mrf.mxu0  ;;  %v2743_v48 = vpop.f32.mrf.mxu1 }
 0x8e1   :  { %2338 = vpow2.f32 %v1885_v45  ;;  %v1886_v49 = vmul.f32 -1.442695, %v2741_v47  ;;  %v1888_v4 = vmul.f32 -1.442695, %v2743_v48 }
 0x8e2   :  { %2340 = vpow2.f32 %v1887_v46 }
 0x8e3   :  { %2342 = vpow2.f32 %v1886_v49 }
 0x8e4   :  { %2344 = vpow2.f32 %v1888_v4 }
 0x8ee   :  { %v2339_v50 = vpop.eup %2338 }
 0x8ef   :  { %v2341_v51 = vpop.eup %2340  ;;  %v1128_v52 = vadd.f32 1.0, %v2339_v50 }
 0x8f0   :  { %v2343_v53 = vpop.eup %2342  ;;  %v1130_v55 = vadd.f32 1.0, %v2341_v51 }
 0x8f1   :  { %v2345_v54 = vpop.eup %2344  ;;  %2346 = vrcp.f32 %v1128_v52  ;;  %v1129_v19 = vadd.f32 1.0, %v2343_v53  ;;  %v3317_v53 = vmov 0 }
 0x8f2   :  { %v1131_v18 = vadd.f32 1.0, %v2345_v54  ;;  %v3318_v53 = vsel %vm2855_vm7, 4294967295, %v3317_v53  ;;  %vm3355_vm7 = vcmp.gt.s32.totalorder %v2800_v11, 0 }
 0x8f3   :  { %2348 = vrcp.f32 %v1129_v19 }
 0x8f4   :  { %2350 = vrcp.f32 %v1131_v18 }
 0x8f5   :  { %2352 = vrcp.f32 %v1130_v55 }
 0x8fe   :  { %v2347_v56 = vpop.eup %2346 }
 0x8ff   :  { %v2748_v58 = vmul.f32 %v2347_v56, %v2735_v43 }
 0x900   :  { %v2349_v28 = vpop.eup %2348 }
 0x901   :  { %v2351_v57 = vpop.eup %2350  ;;  %v2751_v59 = vmul.f32 %v2349_v28, %v2741_v47 }
 0x902   :  { %v2353_v32 = vpop.eup %2352  ;;  %v2754_v60 = vmul.f32 %v2351_v57, %v2743_v48  ;;  %v3319_v57 = vmov 0 }
 0x903   :  { %v2173_v22 = vpack.i.bf16 %v2751_v59, %v2748_v58  ;;  %v2759_v33 = vmul.f32 %v2353_v32, %v2737_v44  ;;  %v3320_v57 = vsel %vm2872_vm6, 4294967295, %v3319_v57 }
 0x904   :  { %v2203_v62 = vpack.i.bf16 %v2748_v58, %v2754_v60 }
 0x905   :  { %2174 = vrot.lane.b32.xlu0 %v2173_v22, %s2455_s16  ;;  %2164 = vrot.lane.b32.xlu1 %v2173_v22, %s2456_s20  ;;  %v2168_v61 = vpack.i.bf16 %v2754_v60, %v2759_v33  ;;  %v2208_v63 = vpack.i.bf16 %v2759_v33, %v2751_v59 }
 0x909   :  { %2184 = vrot.lane.b32.xlu0 %v2173_v22, %s2457_s21  ;;  %2169 = vrot.lane.b32.xlu1 %v2168_v61, %s2456_s20 }
 0x90d   :  { %2194 = vrot.lane.b32.xlu0 %v2173_v22, %s2441_s8  ;;  %2179 = vrot.lane.b32.xlu1 %v2168_v61, %s2455_s16 }
 0x911   :  { %2204 = vrot.lane.b32.xlu0 %v2203_v62, %s2458_s22  ;;  %2189 = vrot.lane.b32.xlu1 %v2168_v61, %s2457_s21 }
 0x915   :  { %2214 = vrot.lane.b32.xlu0 %v2203_v62, %s2440_s7  ;;  %2199 = vrot.lane.b32.xlu1 %v2168_v61, %s2441_s8 }
 0x919   :  { %2224 = vrot.lane.b32.xlu0 %v2203_v62, %s2459_s23  ;;  %2209 = vrot.lane.b32.xlu1 %v2208_v63, %s2458_s22 }
 0x91d   :  { %2234 = vrot.lane.b32.xlu0 %v2203_v62, %s2460_s24  ;;  %2219 = vrot.lane.b32.xlu1 %v2208_v63, %s2440_s7 }
 0x921   :  { %1361 = vperm.xlu0 %2162, %v2781_v2   ;;  %2229 = vrot.lane.b32.xlu1 %v2208_v63, %s2459_s23 }
 0x925   :  { %2239 = vrot.lane.b32.xlu1 %v2208_v63, %s2460_s24 }
 0x977   :  { %v2803_v14 = vpop.permute.xlu0 %2174  ;;  %v2165_v12 = vpop.permute.xlu1 %2164 }
 0x978   :  { %v2167_v15 = vunpack.i.h.bf16 %v2165_v12  ;;  %v2166_v16 = vunpack.i.l.bf16 %v2165_v12  ;;  %v2177_v54 = vunpack.i.h.bf16 %v2803_v14  ;;  %v2176_v55 = vunpack.i.l.bf16 %v2803_v14 }
 0x97a   :  { %v1321_v1 = vsel %vm3252_vm0, %v2166_v16, %v2167_v15 }
 0x97b   :  { %v2185_v24 = vpop.permute.xlu0 %2184  ;;  %v2170_v26 = vpop.permute.xlu1 %2169  ;;  %v1334_v31 = vsel %vm3255_vm11, %v1321_v1, 0.0  ;;  %vm3267_vm11 = vcmp.gt.s32.totalorder %v2800_v11, 0 }
 0x97c   :  { %v2172_v29 = vunpack.i.h.bf16 %v2170_v26  ;;  %v2171_v30 = vunpack.i.l.bf16 %v2170_v26  ;;  %v1355_v42 = vpack.c.bf16 %v1334_v31, %v1334_v31  ;;  %v2187_v45 = vunpack.i.h.bf16 %v2185_v24 }
 0x97d   :  { %v2186_v46 = vunpack.i.l.bf16 %v2185_v24  ;;  %v3321_v31 = vmov 0 }
 0x97e   :  { %v1322_v34 = vsel %vm3252_vm0, %v2167_v15, %v2171_v30  ;;  %v1323_v35 = vsel %vm3252_vm0, %v2171_v30, %v2172_v29  ;;  %v1329_v36 = vsel %vm3252_vm0, %v2172_v29, %v2166_v16  ;;  %vm3262_vm0 = vcmask 924672  }
 0x97f   :  { %v1335_v37 = vsel %vm2825_vm5, %v1322_v34, 0.0  ;;  %v1337_v39 = vsel %vm2833_vm8, %v1329_v36, 0.0  ;;  %v2195_v40 = vpop.permute.xlu0 %2194  ;;  %v2180_v41 = vpop.permute.xlu1 %2179  ;;  %v1336_v52 = vsel %vm3259_vm10, %v1323_v35, 0.0  ;;  %v1368_v56 = vsel %vm3260_vm2, %v1355_v42, 0  ;;  %vm3264_vm10 = vmpackc.low %vm2810_vm4, %vm2872_vm6 }
 0x980   :  { %v2182_v49 = vunpack.i.h.bf16 %v2180_v41  ;;  %v2181_v4 = vunpack.i.l.bf16 %v2180_v41  ;;  %v1356_v50 = vpack.c.bf16 %v1335_v37, %v1335_v37  ;;  %v1358_v51 = vpack.c.bf16 %v1337_v39, %v1337_v39 }
 0x981   :  { %v1357_v28 = vpack.c.bf16 %v1336_v52, %v1336_v52  ;;  %v1299_v32 = vsel %vm3261_vm15, %v2186_v46, %v2187_v45  ;;  %v2197_v22 = vunpack.i.h.bf16 %v2195_v40  ;;  %v2196_v63 = vunpack.i.l.bf16 %v2195_v40 }
 0x982   :  { %1889 = vmatprep.subr.msk.bf16.mxu0 %vm3260_vm2, %v1356_v50  ;;  %1915 = vmatprep.subr.msk.bf16.mxu1 %vm3260_vm2, %v1358_v51  ;;  %v1281_v3 = vsel %vm3262_vm0, %v2182_v49, %v2176_v55  ;;  %v1274_v5 = vsel %vm3262_vm0, %v2177_v54, %v2181_v4  ;;  %v1275_v7 = vsel %vm3262_vm0, %v2181_v4, %v2182_v49  ;;  %v3323_v37 = vmov 0 }
 0x983   :  { %v2865_v19 = vpop.permute.xlu0 %2204  ;;  %v2190_v18 = vpop.permute.xlu1 %2189  ;;  %1386 = vmatpush1.bf16.msra.mxu0 %v1368_v56  ;;  %v1374_v6 = vsel %vm3260_vm2, %v1357_v28, 0  ;;  %v1273_v16 = vsel %vm3262_vm0, %v2176_v55, %v2177_v54  ;;  %vm2896_vm2 = vmpackc.low %vm3269_vm14, %vm3267_vm11  ;;  %v1251_v39 = vsel %vm3265_vm13, %v2196_v63, %v2197_v22  ;;  %v3325_v40 = vmov 0 }
 0x984   :  { %v2192_v61 = vunpack.i.h.bf16 %v2190_v18  ;;  %v2191_v62 = vunpack.i.l.bf16 %v2190_v18  ;;  %1427 = vmatpush1.bf16.msra.mxu1 %v1374_v6  ;;  %v3322_v31 = vsel %vm2896_vm2, 4294967295, %v3321_v31  ;;  %v1894_v34 = vpack.c.bf16 %v1299_v32, %v1273_v16  ;;  %vm2921_vm0 = vmpackc.low %vm3268_vm3, %vm3269_vm14 }
 0x985   :  { %v3326_v40 = vsel %vm2921_vm0, 4294967295, %v3325_v40  ;;  %v3331_v52 = vmov 0  ;;  %v1900_v54 = vpack.c.bf16 %v1251_v39, %v2748_v58  ;;  %vm2961_vm3 = vcmp.ge.s32.totalorder %v60_v0, 16 }
 0x986   :  { %v1307_v14 = vsel %vm3261_vm15, %v2192_v61, %v2186_v46  ;;  %v1300_v12 = vsel %vm3261_vm15, %v2187_v45, %v2191_v62  ;;  %v1301_v15 = vsel %vm3261_vm15, %v2191_v62, %v2192_v61  ;;  %vm2903_vm15 = vmpackc.low %vm3269_vm14, %vm3266_vm9  ;;  %v3328_v46 = vmov 0 }
 0x987   :  { %v1891_v1 = vpack.c.bf16 %v1300_v12, %v1274_v5  ;;  %v1917_v24 = vpack.c.bf16 %v1307_v14, %v1281_v3  ;;  %v1920_v26 = vpack.c.bf16 %v1301_v15, %v1275_v7  ;;  %v2215_v29 = vpop.permute.xlu0 %2214  ;;  %v2200_v30 = vpop.permute.xlu1 %2199  ;;  %v3324_v37 = vsel %vm2903_vm15, 4294967295, %v3323_v37 }
 0x988   :  { %v2202_v35 = vunpack.i.h.bf16 %v2200_v30  ;;  %v2201_v36 = vunpack.i.l.bf16 %v2200_v30  ;;  %v2217_v58 = vunpack.i.h.bf16 %v2215_v29  ;;  %v2216_v18 = vunpack.i.l.bf16 %v2215_v29 }
 0x989   :  { %1892 = vmatprep.subr.msk.bf16.mxu0 %vm3263_vm12, %v1891_v1  ;;  %1918 = vmatprep.subr.msk.bf16.mxu1 %vm3264_vm10, %v1917_v24  ;;  %vm3327_vm12 = vcmp.lt.s32.totalorder %v2796_v10, 15  ;;  %v2207_v0 = vunpack.i.h.bf16 %v2865_v19  ;;  %v2206_v8 = vunpack.i.l.bf16 %v2865_v19  ;;  %v3359_v30 = vmov 0 }
 0x98a   :  { %v1259_v41 = vsel %vm3265_vm13, %v2202_v35, %v2196_v63  ;;  %v1252_v42 = vsel %vm3265_vm13, %v2197_v22, %v2201_v36  ;;  %v1253_v45 = vsel %vm3265_vm13, %v2201_v36, %v2202_v35  ;;  %1895 = vmatpush1.bf16.msk.msra.mxu0 %vm2896_vm2, %v1894_v34  ;;  %vm2933_vm10 = vmpackc.low %vm3327_vm12, %vm3269_vm14  ;;  %1921 = vmatpush1.bf16.msk.msra.mxu1 %vm2903_vm15, %v1920_v26  ;;  %vm3330_vm13 = vcmp.lt.s32.totalorder %v2800_v11, 15 }
 0x98b   :  { %v3329_v46 = vsel %vm2933_vm10, 4294967295, %v3328_v46  ;;  %v1923_v49 = vpack.c.bf16 %v1259_v41, %v2754_v60  ;;  %v1897_v4 = vpack.c.bf16 %v1252_v42, %v2751_v59  ;;  %v1926_v50 = vpack.c.bf16 %v1253_v45, %v2759_v33  ;;  %v2210_v51 = vpop.permute.xlu1 %2209  ;;  %vm2945_vm9 = vmpackc.low %vm3330_vm13, %vm3269_vm14  ;;  %v2950_v55 = vpop.permute.xlu0 %2224 }
 0x98c   :  { %v3332_v52 = vsel %vm2945_vm9, 4294967295, %v3331_v52  ;;  %vm3333_vm12 = vcmp.lt.s32.totalorder %v2819_v23, 15  ;;  %v3334_v59 = vmov 0  ;;  %v3336_v60 = vmov 0 }
 0x98d   :  { %vm2955_vm11 = vmpackc.low %vm3333_vm12, %vm3269_vm14  ;;  %v3337_v60 = vsel %vm2961_vm3, 4294967295, %v3336_v60  ;;  %vm2967_vm13 = vcmp.ge.s32.totalorder %v62_v13, 16  ;;  %v3338_v33 = vmov 0  ;;  %v2212_v56 = vunpack.i.h.bf16 %v2210_v51  ;;  %1898 = vmatprep.subr.msk.bf16.mxu0 %vm2921_vm0, %v1897_v4  ;;  %1924 = vmatprep.subr.msk.bf16.mxu1 %vm2933_vm10, %v1923_v49 }
 0x98e   :  { %v3335_v59 = vsel %vm2955_vm11, 4294967295, %v3334_v59  ;;  %v3339_v33 = vsel %vm2967_vm13, 4294967295, %v3338_v33  ;;  %v2211_v28 = vunpack.i.l.bf16 %v2210_v51  ;;  %1901 = vmatpush1.bf16.msk.msra.mxu0 %vm2945_vm9, %v1900_v54  ;;  %vm3340_vm12 = vcmp.lt.s32.totalorder %v2794_v9, 15  ;;  %1927 = vmatpush1.bf16.msk.msra.mxu1 %vm2955_vm11, %v1926_v50 }
 0x98f   :  { %vm3341_vm14 = vcmp.gt.s32.totalorder %v2794_v9, 0  ;;  %v2220_v13 = vpop.permute.xlu1 %2219  ;;  %vm3344_vm10 = vcmp.lt.s32.totalorder %v2800_v11, 15  ;;  %vm3281_vm0 = vcmask 121856   ;;  %vm3348_vm2 = vcmask 7168   ;;  %v2235_v6 = vpop.permute.xlu0 %2234 }
 0x990   :  { %vm2981_vm15 = vmpackc.low %vm3341_vm14, %vm3340_vm12  ;;  %v2222_v32 = vunpack.i.h.bf16 %v2220_v13  ;;  %v2221_v22 = vunpack.i.l.bf16 %v2220_v13  ;;  %vm3345_vm14 = vcmp.lt.s32.totalorder %v2819_v23, 15  ;;  %v1238_v19 = vsel %vm3348_vm2, %v2216_v18, %v2217_v58 }
 0x991   :  { %vm1214_vm9 = vmand %vm2961_vm3, %vm3344_vm10  ;;  %v1208_v62 = vsel %vm3281_vm0, %v2212_v56, %v2206_v8  ;;  %v1206_v63 = vsel %vm3281_vm0, %v2207_v0, %v2211_v28  ;;  %vm3349_vm11 = vcmp.lt.s32.totalorder %v2796_v10, 15  ;;  %vm3350_vm10 = vcmp.gt.s32.totalorder %v2796_v10, 0 }
 0x992   :  { %vm2997_vm12 = vmand %vm2967_vm13, %vm3345_vm14  ;;  %v1207_v5 = vsel %vm3281_vm0, %v2211_v28, %v2212_v56  ;;  %v1232_v12 = vsel %vm3348_vm2, %v2221_v22, %v2222_v32  ;;  %v1213_v16 = vsel %vm3281_vm0, %v2206_v8, %v2207_v0  ;;  %v2237_v35 = vunpack.i.h.bf16 %v2235_v6 }
 0x993   :  { %vm3008_vm6 = vmpackc.low %vm3350_vm10, %vm3349_vm11  ;;  %v1932_v26 = vpack.c.bf16 %v1232_v12, %v1207_v5  ;;  %v2230_v29 = vpop.permute.xlu1 %2229  ;;  %vm3358_vm11 = vcmp.gt.s32.totalorder %v2819_v23, 0  ;;  %v1906_v34 = vpack.c.bf16 %v1238_v19, %v1213_v16  ;;  %v2236_v36 = vunpack.i.l.bf16 %v2235_v6 }
 0x994   :  { %vm3353_vm14 = vmmov %vm3348_vm2  ;;  %v2232_v39 = vunpack.i.h.bf16 %v2230_v29  ;;  %v2231_v41 = vunpack.i.l.bf16 %v2230_v29  ;;  %v2227_v45 = vunpack.i.h.bf16 %v2950_v55  ;;  %v2226_v49 = vunpack.i.l.bf16 %v2950_v55 }
 0x995   :  { %v1233_v7 = vsel %vm3353_vm14, %v2222_v32, %v2216_v18  ;;  %vm3354_vm4 = vmmov %vm3348_vm2  ;;  %vm3365_vm14 = vcmp.gt.s32.totalorder %v2800_v11, 0  ;;  %v3366_v50 = vmov 0  ;;  %v3369_v54 = vmov 0 }
 0x996   :  { %v1231_v14 = vsel %vm3354_vm4, %v2217_v58, %v2221_v22  ;;  %vm3018_vm1 = vmpackc.low %vm3355_vm7, %vm1214_vm9  ;;  %v1929_v24 = vpack.c.bf16 %v1233_v7, %v1208_v62  ;;  %vm3283_vm7 = vcmask 130048   ;;  %vm3361_vm4 = vcmp.gt.s32.totalorder %v2794_v9, 0 }
 0x997   :  { %v1903_v1 = vpack.c.bf16 %v1231_v14, %v1206_v63  ;;  %vm3027_vm10 = vmpackc.low %vm3358_vm11, %vm2997_vm12  ;;  %vm3362_vm9 = vmmov 1   ;;  %v2240_v4 = vpop.permute.xlu1 %2239  ;;  %vm3286_vm11 = vcmask 138240   ;;  %v1191_v55 = vsel %vm3283_vm7, %v2236_v36, %v2237_v35 }
 0x998   :  { %v3360_v30 = vsel %vm3027_vm10, 4294967295, %v3359_v30  ;;  %1930 = vmatprep.subr.msk.bf16.mxu1 %vm3008_vm6, %v1929_v24  ;;  %vm3042_vm12 = vmpackc.low %vm3362_vm9, %vm3361_vm4  ;;  %v2242_v9 = vunpack.i.h.bf16 %v2240_v4  ;;  %v2241_v51 = vunpack.i.l.bf16 %v2240_v4  ;;  %vm3368_vm4 = vcmp.gt.s32.totalorder %v2819_v23, 0 }
 0x999   :  { %1904 = vmatprep.subr.msk.bf16.mxu0 %vm2981_vm15, %v1903_v1  ;;  %1933 = vmatpush1.bf16.msk.msra.mxu1 %vm3027_vm10, %v1932_v26  ;;  %vm3052_vm2 = vmand %vm2961_vm3, %vm3365_vm14  ;;  %v1160_v58 = vsel %vm3286_vm11, %v2232_v39, %v2226_v49  ;;  %v1158_v18 = vsel %vm3286_vm11, %v2227_v45, %v2231_v41  ;;  %vm3371_vm14 = vcmp.gt.s32.totalorder %v2796_v10, 0  ;;  %v1159_v28 = vsel %vm3286_vm11, %v2231_v41, %v2232_v39 }
 0x99a   :  { %1907 = vmatpush1.bf16.msk.msra.mxu0 %vm3018_vm1, %v1906_v34  ;;  %v3367_v50 = vsel %vm3052_vm2, 4294967295, %v3366_v50  ;;  %vm3060_vm0 = vmand %vm2967_vm13, %vm3368_vm4  ;;  %v1186_v0 = vsel %vm3283_vm7, %v2242_v9, %v2236_v36  ;;  %v1184_v8 = vsel %vm3283_vm7, %v2237_v35, %v2241_v51  ;;  %v1185_v13 = vsel %vm3283_vm7, %v2241_v51, %v2242_v9 }
 0x99b   :  { %v3370_v54 = vsel %vm3060_vm0, 4294967295, %v3369_v54  ;;  %vm3070_vm10 = vmpackc.low %vm3362_vm9, %vm3371_vm14  ;;  %v1165_v10 = vsel %vm3286_vm11, %v2226_v49, %v2227_v45  ;;  %v1909_v32 = vpack.c.bf16 %v1184_v8, %v1158_v18  ;;  %v1935_v22 = vpack.c.bf16 %v1186_v0, %v1160_v58 }
 0x99c   :  { %vm3285_vm4 = vmpackc.low %vm2961_vm3, %vm3052_vm2  ;;  %v1938_v61 = vpack.c.bf16 %v1185_v13, %v1159_v28  ;;  %v1912_v19 = vpack.c.bf16 %v1191_v55, %v1165_v10  ;;  %v1338_v62 = vpack.c.bf16 %v2781_v2, %v2781_v2  ;;  %vm3374_vm14 = vcmask 588800   ;;  %v1362_v2 = vpop.permute.xlu0 %1361 }
 0x99d   :  { %vm3284_vm9 = vmpackc.low %vm2967_vm13, %vm3060_vm0  ;;  %1910 = vmatprep.subr.msk.bf16.mxu0 %vm3042_vm12, %v1909_v32  ;;  %1936 = vmatprep.subr.msk.bf16.mxu1 %vm3070_vm10, %v1935_v22  ;;  %vm3380_vm11 = vcmp.lt.s32.totalorder %v2800_v11, 15  ;;  %vm3404_vm3 = vnez %v3322_v31 }
 0x99e   :  { %1913 = vmatpush1.bf16.msk.msra.mxu0 %vm3285_vm4, %v1912_v19  ;;  %1939 = vmatpush1.bf16.msk.msra.mxu1 %vm3284_vm9, %v1938_v61  ;;  %vm3375_vm7 = vmmov %vm3374_vm14 }
 0x9a1   :  { %1914 = vmatmul.mubr.msk.bf16.vlgmr.msra.gmra.mxu0 %vm3374_vm14, %v1338_v62  ;;  %1940 = vmatmul.mubr.msk.bf16.vlgmr.msra.gmra.mxu1 %vm3375_vm7, %v1338_v62 }
 0x9a2   :  { %1735 = vmatprep.mubr.bf16.mxu0 %v2461_v38  ;;  %1776 = vmatprep.mubr.bf16.mxu1 %v2461_v38 }
 0xa61   :  { %v1413_v63 = vpop.f32.mrf.mxu0  ;;  %v1454_v5 = vpop.f32.mrf.mxu1 }
 0xa62   :  { %v1414_v6 = vadd.f32 %v1413_v63, %v1362_v2  ;;  %v1455_v7 = vadd.f32 %v1454_v5, %v1362_v2  ;;  %v3143_v63 = vld [vmem:[#allocation2 + $0x40] sm:$0xff] }
 0xa63   :  { %v1415_v14 = vpop.f32.mrf.mxu0  ;;  %v1456_v12 = vpop.f32.mrf.mxu1 }
 0xa64   :  { %v1461_v16 = vadd.f32 %v1414_v6, %v2735_v43  ;;  %v1463_v1 = vadd.f32 %v1455_v7, %v2737_v44  ;;  %v1416_v24 = vadd.f32 %v1415_v14, %v1362_v2  ;;  %v1457_v26 = vadd.f32 %v1456_v12, %v1362_v2 }
 0xa65   :  { %v1417_v29 = vpop.f32.mrf.mxu0  ;;  %v1458_v34 = vpop.f32.mrf.mxu1 }
 0xa66   :  { %v1470_v35 = vmin.f32 %v1461_v16, 0.0  ;;  %v1472_v36 = vmin.f32 %v1463_v1, 0.0  ;;  %v1462_v39 = vadd.f32 %v1416_v24, %v2741_v47  ;;  %v1464_v38 = vadd.f32 %v1457_v26, %v2743_v48 }
 0xa67   :  { %v1418_v41 = vpop.f32.mrf.mxu0  ;;  %v1459_v45 = vpop.f32.mrf.mxu1  ;;  %vm1466_vm7 = vcmp.gt.f32.partialorder %v1461_v16, 0.0  ;;  %vm1468_vm9 = vcmp.gt.f32.partialorder %v1463_v1, 0.0 }
 0xa68   :  { %v1474_v49 = vmul.f32 1.442695, %v1470_v35  ;;  %v1478_v4 = vmul.f32 1.442695, %v1472_v36  ;;  %v1471_v9 = vmin.f32 %v1462_v39, 0.0  ;;  %v1473_v51 = vmin.f32 %v1464_v38, 0.0 }
 0xa69   :  { %vm1467_vm14 = vcmp.gt.f32.partialorder %v1462_v39, 0.0  ;;  %vm1469_vm4 = vcmp.gt.f32.partialorder %v1464_v38, 0.0 }
 0xa6a   :  { %2354 = vpow2.f32 %v1474_v49  ;;  %v1476_v43 = vmul.f32 1.442695, %v1471_v9  ;;  %v1480_v44 = vmul.f32 1.442695, %v1473_v51 }
 0xa6b   :  { %2356 = vpow2.f32 %v1478_v4 }
 0xa6c   :  { %2358 = vpow2.f32 %v1476_v43 }
 0xa6d   :  { %2360 = vpow2.f32 %v1480_v44 }
 0xa77   :  { %v2355_v55 = vpop.eup %2354 }
 0xa78   :  { %v2357_v58 = vpop.eup %2356  ;;  %v1941_v18 = vadd.f32 -1.0, %v2355_v55 }
 0xa79   :  { %v2359_v28 = vpop.eup %2358  ;;  %v1943_v0 = vadd.f32 -1.0, %v2357_v58 }
 0xa7a   :  { %v2361_v47 = vpop.eup %2360  ;;  %v1942_v8 = vadd.f32 -1.0, %v2359_v28  ;;  %v3111_v13 = vsel %vm1466_vm7, %v1461_v16, %v1941_v18 }
 0xa7b   :  { %v1944_v48 = vadd.f32 -1.0, %v2361_v47  ;;  %v3115_v32 = vsel %vm1468_vm9, %v1463_v1, %v1943_v0 }
 0xa7c   :  { %v3113_v10 = vsel %vm1467_vm14, %v1462_v39, %v1942_v8 }
 0xa7d   :  { %v3117_v22 = vsel %vm1469_vm4, %v1464_v38, %v1944_v48  ;;  %v2243_v61 = vpack.i.bf16 %v3113_v10, %v3111_v13  ;;  %v2288_v2 = vpack.i.bf16 %v3115_v32, %v3113_v10  ;;  %vm3376_vm4 = vcmask 908288  }
 0xa7e   :  { %v2248_v19 = vpack.i.bf16 %v3117_v22, %v3115_v32  ;;  %v2283_v62 = vpack.i.bf16 %v3111_v13, %v3117_v22  ;;  %vm3377_vm9 = vmmov %vm3376_vm4 }
 0xa7f   :  { %2244 = vrot.lane.b32.xlu1 %v2243_v61, %s2456_s20  ;;  %vm3378_vm7 = vmmov %vm3376_vm4 }
 0xa80   :  { %2249 = vrot.lane.b32.xlu0 %v2248_v19, %s2456_s20  ;;  %vm3379_vm14 = vmmov %vm3376_vm4 }
 0xa83   :  { %2254 = vrot.lane.b32.xlu1 %v2243_v61, %s2455_s16 }
 0xa84   :  { %2259 = vrot.lane.b32.xlu0 %v2248_v19, %s2455_s16 }
 0xa87   :  { %2264 = vrot.lane.b32.xlu1 %v2243_v61, %s2457_s21 }
 0xa88   :  { %2269 = vrot.lane.b32.xlu0 %v2248_v19, %s2457_s21 }
 0xa8b   :  { %2274 = vrot.lane.b32.xlu1 %v2243_v61, %s2441_s8 }
 0xa8c   :  { %2279 = vrot.lane.b32.xlu0 %v2248_v19, %s2441_s8 }
 0xa8f   :  { %2284 = vrot.lane.b32.xlu1 %v2283_v62, %s2458_s22 }
 0xa90   :  { %2289 = vrot.lane.b32.xlu0 %v2288_v2, %s2458_s22 }
 0xa93   :  { %2294 = vrot.lane.b32.xlu1 %v2283_v62, %s2440_s7 }
 0xa94   :  { %2299 = vrot.lane.b32.xlu0 %v2288_v2, %s2440_s7 }
 0xa97   :  { %2304 = vrot.lane.b32.xlu1 %v2283_v62, %s2459_s23 }
 0xa98   :  { %2309 = vrot.lane.b32.xlu0 %v2288_v2, %s2459_s23 }
 0xa9b   :  { %2314 = vrot.lane.b32.xlu1 %v2283_v62, %s2460_s24 }
 0xa9c   :  { %2319 = vrot.lane.b32.xlu0 %v2288_v2, %s2460_s24 }
 0xa9f   :  { %1685 = vperm.xlu1 %2323, %v3143_v63  }
 0xaf1   :  { %v2245_v5 = vpop.permute.xlu1 %2244 }
 0xaf2   :  { %v2250_v6 = vpop.permute.xlu0 %2249  ;;  %v2247_v7 = vunpack.i.h.bf16 %v2245_v5  ;;  %v2246_v14 = vunpack.i.l.bf16 %v2245_v5 }
 0xaf3   :  { %v2252_v12 = vunpack.i.h.bf16 %v2250_v6  ;;  %v2251_v16 = vunpack.i.l.bf16 %v2250_v6 }
 0xaf4   :  { %v1649_v1 = vsel %vm3376_vm4, %v2246_v14, %v2247_v7  ;;  %vm3381_vm4 = vcmp.lt.s32.totalorder %v2819_v23, 15 }
 0xaf5   :  { %v1651_v24 = vsel %vm3377_vm9, %v2251_v16, %v2252_v12  ;;  %v1650_v26 = vsel %vm3378_vm7, %v2247_v7, %v2251_v16  ;;  %v1657_v29 = vsel %vm3379_vm14, %v2252_v12, %v2246_v14  ;;  %v2255_v34 = vpop.permute.xlu1 %2254  ;;  %v1658_v35 = vsel %vm3380_vm11, %v1649_v1, 0.0 }
 0xaf6   :  { %v1659_v36 = vsel %vm2825_vm5, %v1650_v26, 0.0  ;;  %v1661_v39 = vsel %vm2833_vm8, %v1657_v29, 0.0  ;;  %v2260_v38 = vpop.permute.xlu0 %2259  ;;  %v2257_v41 = vunpack.i.h.bf16 %v2255_v34  ;;  %v2256_v45 = vunpack.i.l.bf16 %v2255_v34 }
 0xaf7   :  { %v2262_v49 = vunpack.i.h.bf16 %v2260_v38  ;;  %v2261_v4 = vunpack.i.l.bf16 %v2260_v38  ;;  %v1680_v9 = vpack.c.bf16 %v1659_v36, %v1659_v36  ;;  %v1682_v51 = vpack.c.bf16 %v1661_v39, %v1661_v39 }
 0xaf8   :  { %v1679_v43 = vpack.c.bf16 %v1658_v35, %v1658_v35  ;;  %v1660_v44 = vsel %vm3381_vm4, %v1651_v24, 0.0  ;;  %vm3382_vm9 = vcmask 1043456   ;;  %vm3385_vm8 = vcmask 924672  }
 0xaf9   :  { %1945 = vmatprep.subr.msk.bf16.mxu0 %vm3382_vm9, %v1680_v9  ;;  %vm3383_vm11 = vmmov %vm3382_vm9  ;;  %v2265_v11 = vpop.permute.xlu1 %2264  ;;  %v1681_v18 = vpack.c.bf16 %v1660_v44, %v1660_v44  ;;  %v1609_v28 = vsel %vm3385_vm8, %v2261_v4, %v2262_v49 }
 0xafa   :  { %1971 = vmatprep.subr.msk.bf16.mxu1 %vm3383_vm11, %v1682_v51  ;;  %v2270_v25 = vpop.permute.xlu0 %2269  ;;  %v2267_v55 = vunpack.i.h.bf16 %v2265_v11  ;;  %v2266_v27 = vunpack.i.l.bf16 %v2265_v11  ;;  %vm3384_vm5 = vmmov %vm3382_vm9  ;;  %vm3389_vm9 = vcmask 916480  }
 0xafb   :  { %v1692_v58 = vsel %vm3384_vm5, %v1679_v43, 0  ;;  %vm3386_vm7 = vmmov %vm3385_vm8  ;;  %v2272_v47 = vunpack.i.h.bf16 %v2270_v25  ;;  %v2271_v8 = vunpack.i.l.bf16 %v2270_v25  ;;  %vm3394_vm8 = vnez %v3310_v17 }
 0xafc   :  { %v1607_v0 = vsel %vm3386_vm7, %v2256_v45, %v2257_v41  ;;  %1710 = vmatpush1.bf16.msra.mxu0 %v1692_v58  ;;  %vm3387_vm14 = vmmov %vm3386_vm7  ;;  %v1628_v61 = vsel %vm3389_vm9, %v2266_v27, %v2267_v55 }
 0xafd   :  { %v1608_v23 = vsel %vm3387_vm14, %v2257_v41, %v2261_v4  ;;  %vm3388_vm4 = vmmov %vm3386_vm7  ;;  %v1950_v6 = vpack.c.bf16 %v1628_v61, %v1607_v0  ;;  %v2275_v7 = vpop.permute.xlu1 %2274  ;;  %vm3395_vm7 = vnez %v3318_v53  ;;  %vm3398_vm14 = vnez %v3320_v57 }
 0xafe   :  { %v1615_v48 = vsel %vm3388_vm4, %v2262_v49, %v2256_v45  ;;  %vm3390_vm11 = vmmov %vm3384_vm5  ;;  %v2280_v1 = vpop.permute.xlu0 %2279  ;;  %v2277_v24 = vunpack.i.h.bf16 %v2275_v7  ;;  %v2276_v34 = vunpack.i.l.bf16 %v2275_v7 }
 0xaff   :  { %v1698_v19 = vsel %vm3390_vm11, %v1681_v18, 0  ;;  %vm3391_vm0 = vmmov %vm3389_vm9  ;;  %v2282_v26 = vunpack.i.h.bf16 %v2280_v1  ;;  %v2281_v29 = vunpack.i.l.bf16 %v2280_v1  ;;  %vm3400_vm9 = vcmask 1039360  }
 0xb00   :  { %v1630_v62 = vsel %vm3391_vm0, %v2271_v8, %v2272_v47  ;;  %vm3392_vm13 = vmmov %vm3391_vm0  ;;  %1751 = vmatpush1.bf16.msra.mxu1 %v1698_v19 }
 0xb01   :  { %v1629_v2 = vsel %vm3392_vm13, %v2267_v55, %v2271_v8  ;;  %vm3393_vm5 = vmmov %vm3391_vm0  ;;  %v1976_v14 = vpack.c.bf16 %v1630_v62, %v1609_v28  ;;  %vm3397_vm13 = vnez %v3312_v20  ;;  %v1588_v35 = vsel %vm3400_vm9, %v2281_v29, %v2282_v26  ;;  %v2285_v17 = vpop.permute.xlu1 %2284 }
 0xb02   :  { %v1636_v5 = vsel %vm3393_vm5, %v2272_v47, %v2266_v27  ;;  %v1947_v12 = vpack.c.bf16 %v1629_v2, %v1608_v23  ;;  %vm3396_vm0 = vmpackc.low %vm3394_vm8, %vm3395_vm7  ;;  %v1982_v53 = vpack.c.bf16 %v1588_v35, %v3115_v32  ;;  %vm3405_vm8 = vnez %v3324_v37  ;;  %v2290_v45 = vpop.permute.xlu0 %2289 }
 0xb03   :  { %v1973_v16 = vpack.c.bf16 %v1636_v5, %v1615_v48  ;;  %vm3399_vm4 = vmpackc.low %vm3397_vm13, %vm3398_vm14  ;;  %v2292_v49 = vunpack.i.h.bf16 %v2290_v45  ;;  %v2291_v4 = vunpack.i.l.bf16 %v2290_v45  ;;  %v2287_v9 = vunpack.i.h.bf16 %v2285_v17 }
 0xb04   :  { %1948 = vmatprep.subr.msk.bf16.mxu0 %vm3396_vm0, %v1947_v12  ;;  %vm3401_vm11 = vmmov %vm3400_vm9  ;;  %v2286_v51 = vunpack.i.l.bf16 %v2285_v17  ;;  %vm3408_vm7 = vnez %v3332_v52  ;;  %vm3409_vm0 = vnez %v3335_v59  ;;  %vm3410_vm13 = vcmask 121856  }
 0xb05   :  { %1974 = vmatprep.subr.msk.bf16.mxu1 %vm3399_vm4, %v1973_v16  ;;  %v1587_v36 = vsel %vm3401_vm11, %v2277_v24, %v2281_v29  ;;  %vm3402_vm5 = vmmov %vm3400_vm9  ;;  %1951 = vmatpush1.bf16.msk.msra.mxu0 %vm3404_vm3, %v1950_v6  ;;  %vm3407_vm3 = vnez %v3329_v46  ;;  %v2295_v31 = vpop.permute.xlu1 %2294  ;;  %v1546_v32 = vsel %vm3410_vm13, %v2291_v4, %v2292_v49  ;;  %vm3414_vm11 = vcmask 7168  }
 0xb06   :  { %v1586_v39 = vsel %vm3402_vm5, %v2276_v34, %v2277_v24  ;;  %vm3403_vm2 = vmmov %vm3402_vm5  ;;  %v1953_v20 = vpack.c.bf16 %v1587_v36, %v3113_v10  ;;  %1977 = vmatpush1.bf16.msk.msra.mxu1 %vm3405_vm8, %v1976_v14  ;;  %v2300_v37 = vpop.permute.xlu0 %2299  ;;  %v2296_v10 = vunpack.i.l.bf16 %v2295_v31 }
 0xb07   :  { %v1594_v38 = vsel %vm3403_vm2, %v2282_v26, %v2276_v34  ;;  %v1956_v57 = vpack.c.bf16 %v1586_v39, %v3111_v13  ;;  %vm3406_vm2 = vnez %v3326_v40  ;;  %v2297_v13 = vunpack.i.h.bf16 %v2295_v31  ;;  %vm3411_vm14 = vmmov %vm3410_vm13 }
 0xb08   :  { %v1979_v41 = vpack.c.bf16 %v1594_v38, %v3117_v22  ;;  %1954 = vmatprep.subr.msk.bf16.mxu0 %vm3406_vm2, %v1953_v20  ;;  %v2302_v22 = vunpack.i.h.bf16 %v2300_v37  ;;  %v2301_v43 = vunpack.i.l.bf16 %v2300_v37  ;;  %v1545_v40 = vsel %vm3411_vm14, %v2287_v9, %v2291_v4  ;;  %vm3412_vm4 = vmmov %vm3410_vm13 }
 0xb09   :  { %1957 = vmatpush1.bf16.msk.msra.mxu0 %vm3408_vm7, %v1956_v57  ;;  %v1547_v44 = vsel %vm3412_vm4, %v2292_v49, %v2286_v51  ;;  %vm3413_vm9 = vmmov %vm3412_vm4  ;;  %v1573_v52 = vsel %vm3414_vm11, %v2296_v10, %v2297_v13  ;;  %v2305_v27 = vpop.permute.xlu1 %2304  ;;  %vm3419_vm7 = vcmask 138240   ;;  %v1662_v34 = vpack.c.bf16 %v3143_v63, %v3143_v63 }
 0xb0a   :  { %1980 = vmatprep.subr.msk.bf16.mxu1 %vm3407_vm3, %v1979_v41  ;;  %v1552_v46 = vsel %vm3413_vm9, %v2286_v51, %v2287_v9  ;;  %vm3415_vm5 = vmmov %vm3414_vm11  ;;  %v2310_v0 = vpop.permute.xlu0 %2309  ;;  %v2307_v23 = vunpack.i.h.bf16 %v2305_v27  ;;  %v2306_v48 = vunpack.i.l.bf16 %v2305_v27  ;;  %vm3418_vm3 = vnez %v3360_v30 }
 0xb0b   :  { %1983 = vmatpush1.bf16.msk.msra.mxu1 %vm3409_vm0, %v1982_v53  ;;  %v1567_v11 = vsel %vm3415_vm5, %v2301_v43, %v2302_v22  ;;  %vm3416_vm8 = vmmov %vm3415_vm5  ;;  %v1962_v55 = vpack.c.bf16 %v1573_v52, %v1552_v46  ;;  %v2312_v47 = vunpack.i.h.bf16 %v2310_v0  ;;  %v2311_v8 = vunpack.i.l.bf16 %v2310_v0 }
 0xb0c   :  { %v1566_v59 = vsel %vm3416_vm8, %v2297_v13, %v2301_v43  ;;  %vm3417_vm2 = vmmov %vm3415_vm5  ;;  %v1988_v58 = vpack.c.bf16 %v1567_v11, %v1546_v32  ;;  %vm3427_vm9 = vnez %v3337_v60  ;;  %vm3428_vm11 = vnez %v3367_v50 }
 0xb0d   :  { %v1568_v25 = vsel %vm3417_vm2, %v2302_v22, %v2296_v10  ;;  %v1959_v18 = vpack.c.bf16 %v1566_v59, %v1545_v40  ;;  %v2315_v61 = vpop.permute.xlu1 %2314  ;;  %v1504_v5 = vsel %vm3419_vm7, %v2311_v8, %v2312_v47  ;;  %vm3420_vm0 = vmmov %vm3419_vm7  ;;  %vm3430_vm8 = vnez %v3339_v33 }
 0xb0e   :  { %v1985_v28 = vpack.c.bf16 %v1568_v25, %v1547_v44  ;;  %v2320_v19 = vpop.permute.xlu0 %2319  ;;  %v2317_v62 = vunpack.i.h.bf16 %v2315_v61  ;;  %v2316_v2 = vunpack.i.l.bf16 %v2315_v61  ;;  %v1503_v21 = vsel %vm3420_vm0, %v2307_v23, %v2311_v8  ;;  %vm3422_vm13 = vmmov %vm3420_vm0 }
 0xb0f   :  { %1960 = vmatprep.subr.msk.bf16.mxu0 %vm2981_vm15, %v1959_v18  ;;  %v2322_v6 = vunpack.i.h.bf16 %v2320_v19  ;;  %v2321_v7 = vunpack.i.l.bf16 %v2320_v19  ;;  %vm3421_vm15 = vmmov %vm3420_vm0  ;;  %v1510_v3 = vsel %vm3422_vm13, %v2306_v48, %v2307_v23  ;;  %vm3431_vm2 = vnez %v3370_v54 }
 0xb10   :  { %1986 = vmatprep.subr.msk.bf16.mxu1 %vm3008_vm6, %v1985_v28  ;;  %1963 = vmatpush1.bf16.msk.msra.mxu0 %vm3018_vm1, %v1962_v55  ;;  %v1505_v14 = vsel %vm3421_vm15, %v2312_v47, %v2306_v48  ;;  %vm3423_vm6 = vcmask 130048   ;;  %vm3429_vm5 = vmpackc.low %vm3427_vm9, %vm3428_vm11  ;;  %vm3433_vm7 = vcmask 588800  }
 0xb11   :  { %1989 = vmatpush1.bf16.msk.msra.mxu1 %vm3418_vm3, %v1988_v58  ;;  %v1531_v15 = vsel %vm3423_vm6, %v2316_v2, %v2317_v62  ;;  %vm3424_vm1 = vmmov %vm3423_vm6 }
 0xb12   :  { %v1525_v12 = vsel %vm3424_vm1, %v2321_v7, %v2322_v6  ;;  %vm3425_vm14 = vmmov %vm3424_vm1  ;;  %v1968_v1 = vpack.c.bf16 %v1531_v15, %v1510_v3 }
 0xb13   :  { %v1524_v30 = vsel %vm3425_vm14, %v2317_v62, %v2321_v7  ;;  %vm3426_vm4 = vmmov %vm3424_vm1  ;;  %v1994_v24 = vpack.c.bf16 %v1525_v12, %v1504_v5 }
 0xb14   :  { %v1526_v16 = vsel %vm3426_vm4, %v2322_v6, %v2316_v2  ;;  %v1965_v26 = vpack.c.bf16 %v1524_v30, %v1503_v21  ;;  %vm3432_vm3 = vmpackc.low %vm3430_vm8, %vm3431_vm2 }
 0xb15   :  { %v1991_v29 = vpack.c.bf16 %v1526_v16, %v1505_v14 }
 0xb16   :  { %1966 = vmatprep.subr.msk.bf16.mxu0 %vm3042_vm12, %v1965_v26  ;;  %vm3434_vm12 = vmmov %vm3433_vm7 }
 0xb17   :  { %1992 = vmatprep.subr.msk.bf16.mxu1 %vm3070_vm10, %v1991_v29  ;;  %1969 = vmatpush1.bf16.msk.msra.mxu0 %vm3429_vm5, %v1968_v1 }
 0xb18   :  { %1995 = vmatpush1.bf16.msk.msra.mxu1 %vm3432_vm3, %v1994_v24 }
 0xb1a   :  { %1970 = vmatmul.mubr.msk.bf16.vlgmr.msra.gmra.mxu0 %vm3433_vm7, %v1662_v34  ;;  %v1686_v42 = vpop.permute.xlu1 %1685 }
 0xb1b   :  { %1996 = vmatmul.mubr.msk.bf16.vlgmr.msra.gmra.mxu1 %vm3434_vm12, %v1662_v34 }
 0xbda   :  { %v1737_v56 = vpop.f32.mrf.mxu0 }
 0xbdb   :  { %v1778_v35 = vpop.f32.mrf.mxu1  ;;  %v1738_v63 = vadd.f32 %v1737_v56, %v1686_v42 }
 0xbdc   :  { %v1779_v36 = vadd.f32 %v1778_v35, %v1686_v42  ;;  %v1739_v60 = vpop.f32.mrf.mxu0 }
 0xbdd   :  { %v1780_v39 = vpop.f32.mrf.mxu1  ;;  %v1740_v50 = vadd.f32 %v1739_v60, %v1686_v42  ;;  %v1997_v17 = vmul.f32 -1.442695, %v1738_v63 }
 0xbde   :  { %v1781_v38 = vadd.f32 %v1780_v39, %v1686_v42  ;;  %v1999_v53 = vmul.f32 -1.442695, %v1779_v36  ;;  %v1741_v33 = vpop.f32.mrf.mxu0 }
 0xbdf   :  { %v1782_v20 = vpop.f32.mrf.mxu1  ;;  %2362 = vpow2.f32 %v1997_v17  ;;  %v1998_v54 = vmul.f32 -1.442695, %v1740_v50 }
 0xbe0   :  { %v2000_v57 = vmul.f32 -1.442695, %v1781_v38  ;;  %2364 = vpow2.f32 %v1999_v53  ;;  %v1742_v41 = vpop.f32.mrf.mxu0 }
 0xbe1   :  { %v1783_v45 = vpop.f32.mrf.mxu1  ;;  %2366 = vpow2.f32 %v1998_v54 }
 0xbe2   :  { %2368 = vpow2.f32 %v2000_v57 }
 0xbec   :  { %v2363_v49 = vpop.eup %2362 }
 0xbed   :  { %v2365_v4 = vpop.eup %2364  ;;  %v1797_v9 = vadd.f32 1.0, %v2363_v49 }
 0xbee   :  { %v2367_v51 = vpop.eup %2366  ;;  %v1799_v31 = vadd.f32 1.0, %v2365_v4 }
 0xbef   :  { %v2369_v37 = vpop.eup %2368  ;;  %v1798_v13 = vadd.f32 1.0, %v2367_v51  ;;  %2370 = vrcp.f32 %v1797_v9 }
 0xbf0   :  { %v1800_v10 = vadd.f32 1.0, %v2369_v37  ;;  %2372 = vrcp.f32 %v1799_v31 }
 0xbf1   :  { %2374 = vrcp.f32 %v1798_v13 }
 0xbf2   :  { %2376 = vrcp.f32 %v1800_v10 }
 0xbfc   :  { %v2371_v32 = vpop.eup %2370 }
 0xbfd   :  { %v2373_v22 = vpop.eup %2372  ;;  %v1809_v43 = vmul.f32 2.0, %v2371_v32 }
 0xbfe   :  { %v2375_v40 = vpop.eup %2374  ;;  %v1811_v44 = vmul.f32 2.0, %v2373_v22 }
 0xbff   :  { %v2377_v46 = vpop.eup %2376  ;;  %v1810_v52 = vmul.f32 2.0, %v2375_v40  ;;  %v2001_v59 = vadd.f32 -1.0, %v1809_v43 }
 0xc00   :  { %v1812_v11 = vmul.f32 2.0, %v2377_v46  ;;  %v2003_v55 = vadd.f32 -1.0, %v1811_v44 }
 0xc01   :  { %v2002_v25 = vadd.f32 -1.0, %v1810_v52 }
 0xc02   :  { %v2004_v27 = vadd.f32 -1.0, %v1812_v11 }
 0xc03   :  { %v1819_v58 = vcombine.low %v2001_v59, %v2002_v25 }
 0xc04   :  { %v1824_v18 = vcombine.low %v2003_v55, %v2004_v27 }
 0xc05   :  { %1821 = vst [vmem:[%s3251_s3] sm:$0x77] %v1819_v58 }
 0xc06   :  { %2005 = vst [vmem:[%s3251_s3 + $0x8] sm:$0x77] %v1824_v18 }
 0xc07   :  { %1832 = vsyncpa [#allocation3], 1 }
 0xc08   :  { %1833 = vsyncpa [#allocation5], 1 }

</bundles_post_ra>
